<compile_context>
chip_gen: v5e
topology: v5e:2x2
jax: 0.10.0
libtpu: 0.0.40
codegen_flags: <defaults>
</compile_context>

<pallas_src>
import jax
import jax.numpy as jnp
from jax.experimental import pallas as pl
from jax.experimental.pallas import tpu as pltpu

NEG_SLOPE = 0.2   # F.leaky_relu negative_slope in the reference module
LANE = 128        # TPU lane width


def _pointnet_kernel(x_ref,
                     w1_ref, b1_ref, w2_ref, b2_ref, w3_ref, b3_ref,
                     w4_ref, b4_ref, w5_ref, b5_ref,
                     l1w_ref, l1b_ref, l2w_ref, l2b_ref, l3w_ref, l3b_ref,
                     o_ref):
    bt, n_pts, cin = x_ref.shape
    # Flatten Bt clouds into one (Bt*N, C) slab so the per-point matmuls fill
    # the MXU M dimension instead of issuing N-row matmuls per cloud.
    x = x_ref[...].reshape(bt * n_pts, cin)

    def mm(a, w_ref):
        # bf16 operands, f32 accumulation on the MXU.
        return jnp.dot(a.astype(jnp.bfloat16), w_ref[...],
                       preferred_element_type=jnp.float32)

    def conv(a, w_ref, b_ref):
        # conv_k (kernel_size=1) + folded BN + ReLU
        return jnp.maximum(mm(a, w_ref) + b_ref[...], 0.0)

    h = conv(x, w1_ref, b1_ref)          # (Bt*N, 64)
    h = conv(h, w2_ref, b2_ref)          # (Bt*N, 64)
    h = conv(h, w3_ref, b3_ref)          # (Bt*N, 64)
    h = conv(h, w4_ref, b4_ref)          # (Bt*N, 128)
    h = conv(h, w5_ref, b5_ref)          # (Bt*N, E)

    emb = h.shape[-1]
    h3 = h.reshape(bt, n_pts, emb)
    x1 = jnp.max(h3, axis=1)                        # adaptive_max_pool1d -> (Bt, E)
    x2 = jnp.sum(h3, axis=1) * (1.0 / n_pts)        # adaptive_avg_pool1d -> (Bt, E)
    feat = jnp.concatenate([x1, x2], axis=1)        # (Bt, 2E)

    def leaky(v):
        return jnp.where(v > 0, v, NEG_SLOPE * v)

    h1 = leaky(mm(feat, l1w_ref) + l1b_ref[...])    # linear1 + bn6 -> (Bt, 512)
    # dp1: identity (inference)
    h2 = leaky(mm(h1, l2w_ref) + l2b_ref[...])      # linear2 + bn7 -> (Bt, 256)
    # dp2: identity (inference)
    out = mm(h2, l3w_ref) + l3b_ref[...]            # linear3 -> (Bt, OUT_PAD)

    o_ref[...] = out[None].astype(o_ref.dtype)      # (1, Bt, OUT_PAD), lane-dense


def _choose_block_b(B, N, emb_dims):
    """Pick clouds-per-grid-step (Bt)."""
    # Live f32 activation slab is roughly (Bt*N, max(128, E)); keep it under
    # ~8 MiB so the per-step working set (plus bf16 copies and double-buffered
    # x blocks) stays comfortably inside v7x's 64 MiB VMEM.
    width = max(LANE, emb_dims)
    rows_cap = max(1, (8 << 20) // (width * 4))
    bt = max(1, min(B, rows_cap // max(N, 1)))
    if B >= 2:
        # Keep at least 2 grid blocks so both v7x TensorCores get work
        # (harmless on single-TC v5e/v6e).
        bt = min(bt, max(1, B // 2))
    return bt


def pointnet_forward(x_bnc, params, *, block_b=None):
    """x_bnc: (B, N, 3) float32. Returns (B, output_channels) float32."""
    B, N, Cin = x_bnc.shape
    emb_dims = params["w5"].shape[1]
    out_ch = params["l3w"].shape[1]
    out_pad = ((out_ch + LANE - 1) // LANE) * LANE   # lane-dense output width

    if block_b is None:
        block_b = _choose_block_b(B, N, emb_dims)
    grid_b = pl.cdiv(B, block_b)
    b_pad = grid_b * block_b
    if b_pad != B:
        x_bnc = jnp.pad(x_bnc, ((0, b_pad - B), (0, 0), (0, 0)))

    # Pad linear3 to a full 128-lane output; zero columns are sliced off below.
    l3w = jnp.pad(params["l3w"], ((0, 0), (0, out_pad - out_ch)))
    l3b = jnp.pad(params["l3b"], ((0, 0), (0, out_pad - out_ch)))

    def wcast(a):  # matmul operands in bf16; biases stay f32 (added post-MXU)
        return a.astype(jnp.bfloat16)

    weight_args = [
        wcast(params["w1"]), params["b1"],
        wcast(params["w2"]), params["b2"],
        wcast(params["w3"]), params["b3"],
        wcast(params["w4"]), params["b4"],
        wcast(params["w5"]), params["b5"],
        wcast(params["l1w"]), params["l1b"],
        wcast(params["l2w"]), params["l2b"],
        wcast(l3w), l3b,
    ]

    def const_spec(a):
        nd = a.ndim
        return pl.BlockSpec(a.shape, lambda i, _nd=nd: (0,) * _nd)

    out = pl.pallas_call(
        _pointnet_kernel,
        out_shape=jax.ShapeDtypeStruct((grid_b, block_b, out_pad), jnp.float32),
        grid_spec=pltpu.PrefetchScalarGridSpec(
            num_scalar_prefetch=0,
            grid=(grid_b,),
            in_specs=[pl.BlockSpec((block_b, N, Cin), lambda i: (i, 0, 0))]
                     + [const_spec(a) for a in weight_args],
            out_specs=pl.BlockSpec((1, block_b, out_pad), lambda i: (i, 0, 0)),
        ),
        compiler_params=pltpu.CompilerParams(
            dimension_semantics=("parallel",)),
    )(x_bnc, *weight_args)

    return out.reshape(b_pad, out_pad)[:B, :out_ch]


# ----------------------------------------------------------------------------
# Deterministic parameter construction (synthetic; shapes from __init__)
# ----------------------------------------------------------------------------
def _init_params(key, emb_dims=64, output_channels=40, eps=1e-5):
    ks = jax.random.split(key, 24)
    ki = iter(range(24))

    def nxt():
        return ks[next(ki)]

    def mat(k, cin, cout):
        # torch default init range: U(-1/sqrt(fan_in), 1/sqrt(fan_in)); stored as (in, out)
        bound = 1.0 / float(cin) ** 0.5
        return jax.random.uniform(k, (cin, cout), jnp.float32, -bound, bound)

    def bn_params(k, c):
        k1, k2, k3 = jax.random.split(k, 3)
        gamma = 1.0 + 0.1 * jax.random.normal(k1, (c,), jnp.float32)
        beta = 0.1 * jax.random.normal(k2, (c,), jnp.float32)
        mean = 0.05 * jax.random.normal(k3, (c,), jnp.float32)
        var = jnp.ones((c,), jnp.float32)
        return gamma, beta, mean, var

    def fold_bn(w, bnp, bias=None):
        gamma, beta, mean, var = bnp
        s = gamma / jnp.sqrt(var + eps)
        w_f = w * s[None, :]
        b0 = bias if bias is not None else jnp.zeros_like(mean)
        b_f = s * (b0 - mean) + beta
        return w_f, b_f[None, :]

    p = {}
    # conv1..conv5 (bias=False) fused with bn1..bn5
    dims = [(3, 64), (64, 64), (64, 64), (64, 128), (128, emb_dims)]
    for i, (cin, cout) in enumerate(dims, start=1):
        w = mat(nxt(), cin, cout)
        p[f"w{i}"], p[f"b{i}"] = fold_bn(w, bn_params(nxt(), cout))

    # linear1 (bias=False) fused with bn6
    w = mat(nxt(), emb_dims * 2, 512)
    p["l1w"], p["l1b"] = fold_bn(w, bn_params(nxt(), 512))

    # linear2 (with bias) fused with bn7
    w = mat(nxt(), 512, 256)
    b = 0.01 * jax.random.normal(nxt(), (256,), jnp.float32)
    p["l2w"], p["l2b"] = fold_bn(w, bn_params(nxt(), 256), bias=b)

    # linear3 (with bias), no BN
    p["l3w"] = mat(nxt(), 256, output_channels)
    p["l3b"] = (0.01 * jax.random.normal(nxt(), (output_channels,),
                                         jnp.float32))[None, :]
    return p


def _reference_f32(x_bnc, p):
    """Pure-JAX f32 reference of the (folded, inference) forward pass."""
    def leaky(v):
        return jnp.where(v > 0, v, NEG_SLOPE * v)

    h = jnp.maximum(x_bnc @ p["w1"] + p["b1"], 0.0)
    h = jnp.maximum(h @ p["w2"] + p["b2"], 0.0)
    h = jnp.maximum(h @ p["w3"] + p["b3"], 0.0)
    h = jnp.maximum(h @ p["w4"] + p["b4"], 0.0)
    h = jnp.maximum(h @ p["w5"] + p["b5"], 0.0)
    x1 = jnp.max(h, axis=1)
    x2 = jnp.mean(h, axis=1)
    feat = jnp.concatenate([x1, x2], axis=1)
    h1 = leaky(feat @ p["l1w"] + p["l1b"])
    h2 = leaky(h1 @ p["l2w"] + p["l2b"])
    return h2 @ p["l3w"] + p["l3b"]


def _reference_matched(x_bnc, p):
    """Pure-JAX reference mirroring the kernel's bf16-matmul / f32-accumulate math."""
    def mm(a, w):
        return jnp.dot(a.astype(jnp.bfloat16), w.astype(jnp.bfloat16),
                       preferred_element_type=jnp.float32)

    def leaky(v):
        return jnp.where(v > 0, v, NEG_SLOPE * v)

    B, N, Cin = x_bnc.shape
    h = x_bnc.reshape(B * N, Cin)
    h = jnp.maximum(mm(h, p["w1"]) + p["b1"], 0.0)
    h = jnp.maximum(mm(h, p["w2"]) + p["b2"], 0.0)
    h = jnp.maximum(mm(h, p["w3"]) + p["b3"], 0.0)
    h = jnp.maximum(mm(h, p["w4"]) + p["b4"], 0.0)
    h = jnp.maximum(mm(h, p["w5"]) + p["b5"], 0.0)
    h = h.reshape(B, N, -1)
    x1 = jnp.max(h, axis=1)
    x2 = jnp.sum(h, axis=1) * (1.0 / N)
    feat = jnp.concatenate([x1, x2], axis=1)
    h1 = leaky(mm(feat, p["l1w"]) + p["l1b"])
    h2 = leaky(mm(h1, p["l2w"]) + p["l2b"])
    return mm(h2, p["l3w"]) + p["l3b"]


if __name__ == "__main__":
    B, N = 2, 128          # batch, points per cloud
    EMB = 64               # args.emb_dims (small)
    OUT = 40               # output_channels

    key = jax.random.PRNGKey(0)
    k_x, k_p = jax.random.split(key)

    # PyTorch-style input: (B, 3, N)  ->  kernel layout (B, N, 3)
    # TODO(synk): at realistic N (>=1k) feed the NCL layout and transpose
    #             in-kernel to avoid the lane-padded (N, 3) DMA.
    x_torch_layout = jax.random.normal(k_x, (B, 3, N), jnp.float32)
    x_bnc = jnp.transpose(x_torch_layout, (0, 2, 1))

    params = _init_params(k_p, emb_dims=EMB, output_channels=OUT)

    y = pointnet_forward(x_bnc, params)
    y = jax.block_until_ready(y)
    assert y.shape == (B, OUT)

    y_matched = _reference_matched(x_bnc, params)   # same bf16/f32 math
    y_f32 = _reference_f32(x_bnc, params)           # exact f32 model

    err_matched = float(jnp.max(jnp.abs(y - y_matched)))
    err_f32 = float(jnp.max(jnp.abs(y - y_f32)))
    assert err_matched < 1e-2, f"mismatch vs matched-precision reference: {err_matched}"
    assert err_f32 < 1e-1, f"mismatch vs f32 reference: {err_f32}"

    print("KERNEL_OK")
</pallas_src>

<mosaic_0001>
module attributes {stable_mosaic.version = 11 : i64} {
  func.func @_pointnet_kernel(%arg0: i32, %arg1: memref<1x128x3xf32, #tpu.memory_space<vmem>>, %arg2: memref<3x64xbf16, #tpu.memory_space<vmem>>, %arg3: memref<1x64xf32, #tpu.memory_space<vmem>>, %arg4: memref<64x64xbf16, #tpu.memory_space<vmem>>, %arg5: memref<1x64xf32, #tpu.memory_space<vmem>>, %arg6: memref<64x64xbf16, #tpu.memory_space<vmem>>, %arg7: memref<1x64xf32, #tpu.memory_space<vmem>>, %arg8: memref<64x128xbf16, #tpu.memory_space<vmem>>, %arg9: memref<1x128xf32, #tpu.memory_space<vmem>>, %arg10: memref<128x64xbf16, #tpu.memory_space<vmem>>, %arg11: memref<1x64xf32, #tpu.memory_space<vmem>>, %arg12: memref<128x512xbf16, #tpu.memory_space<vmem>>, %arg13: memref<1x512xf32, #tpu.memory_space<vmem>>, %arg14: memref<512x256xbf16, #tpu.memory_space<vmem>>, %arg15: memref<1x256xf32, #tpu.memory_space<vmem>>, %arg16: memref<256x128xbf16, #tpu.memory_space<vmem>>, %arg17: memref<1x128xf32, #tpu.memory_space<vmem>>, %arg18: memref<1x1x128xf32, #tpu.memory_space<vmem>>) attributes {dimension_semantics = [#tpu.dimension_semantics<parallel>], iteration_bounds = array<i64: 2>, scalar_prefetch = 0 : i64, scratch_operands = 0 : i64, tpu.core_type = #tpu.core_type<tc>, window_params = [{transform_indices = @transform_0, window_bounds = array<i64: 1, 128, 3>}, {pipeline_mode = #tpu.pipeline_mode<synchronous>, transform_indices = @transform_1, window_bounds = array<i64: 3, 64>}, {pipeline_mode = #tpu.pipeline_mode<synchronous>, transform_indices = @transform_2, window_bounds = array<i64: 1, 64>}, {pipeline_mode = #tpu.pipeline_mode<synchronous>, transform_indices = @transform_3, window_bounds = array<i64: 64, 64>}, {pipeline_mode = #tpu.pipeline_mode<synchronous>, transform_indices = @transform_4, window_bounds = array<i64: 1, 64>}, {pipeline_mode = #tpu.pipeline_mode<synchronous>, transform_indices = @transform_5, window_bounds = array<i64: 64, 64>}, {pipeline_mode = #tpu.pipeline_mode<synchronous>, transform_indices = @transform_6, window_bounds = array<i64: 1, 64>}, {pipeline_mode = #tpu.pipeline_mode<synchronous>, transform_indices = @transform_7, window_bounds = array<i64: 64, 128>}, {pipeline_mode = #tpu.pipeline_mode<synchronous>, transform_indices = @transform_8, window_bounds = array<i64: 1, 128>}, {pipeline_mode = #tpu.pipeline_mode<synchronous>, transform_indices = @transform_9, window_bounds = array<i64: 128, 64>}, {pipeline_mode = #tpu.pipeline_mode<synchronous>, transform_indices = @transform_10, window_bounds = array<i64: 1, 64>}, {pipeline_mode = #tpu.pipeline_mode<synchronous>, transform_indices = @transform_11, window_bounds = array<i64: 128, 512>}, {pipeline_mode = #tpu.pipeline_mode<synchronous>, transform_indices = @transform_12, window_bounds = array<i64: 1, 512>}, {pipeline_mode = #tpu.pipeline_mode<synchronous>, transform_indices = @transform_13, window_bounds = array<i64: 512, 256>}, {pipeline_mode = #tpu.pipeline_mode<synchronous>, transform_indices = @transform_14, window_bounds = array<i64: 1, 256>}, {pipeline_mode = #tpu.pipeline_mode<synchronous>, transform_indices = @transform_15, window_bounds = array<i64: 256, 128>}, {pipeline_mode = #tpu.pipeline_mode<synchronous>, transform_indices = @transform_16, window_bounds = array<i64: 1, 128>}, {transform_indices = @transform_17, window_bounds = array<i64: 1, 1, 128>}]} {
    %c0 = arith.constant 0 : index
    %c0_0 = arith.constant 0 : index
    %c0_1 = arith.constant 0 : index
    %0 = vector.load %arg1[%c0, %c0_0, %c0_1] : memref<1x128x3xf32, #tpu.memory_space<vmem>>, vector<1x128x3xf32>
    %1 = vector.shape_cast %0 : vector<1x128x3xf32> to vector<128x3xf32>
    %2 = arith.truncf %1 : vector<128x3xf32> to vector<128x3xbf16>
    %c0_2 = arith.constant 0 : index
    %c0_3 = arith.constant 0 : index
    %3 = vector.load %arg2[%c0_2, %c0_3] : memref<3x64xbf16, #tpu.memory_space<vmem>>, vector<3x64xbf16>
    %cst = arith.constant dense<0.000000e+00> : vector<128x64xf32>
    %4 = tpu.matmul %2, %3, %cst {dimension_numbers = #tpu.dot_dimension_numbers<[1], [0], [0], [1], [0, 0, 1, 1], [], []>} : vector<128x3xbf16>, vector<3x64xbf16>, vector<128x64xf32> -> vector<128x64xf32>
    %c0_4 = arith.constant 0 : index
    %c0_5 = arith.constant 0 : index
    %5 = vector.load %arg3[%c0_4, %c0_5] : memref<1x64xf32, #tpu.memory_space<vmem>>, vector<1x64xf32>
    %6 = vector.broadcast %5 : vector<1x64xf32> to vector<128x64xf32>
    %7 = arith.addf %4, %6 : vector<128x64xf32>
    %cst_6 = arith.constant 0.000000e+00 : f32
    %8 = vector.broadcast %cst_6 : f32 to vector<128x64xf32>
    %9 = arith.maximumf %7, %8 : vector<128x64xf32>
    %10 = arith.truncf %9 : vector<128x64xf32> to vector<128x64xbf16>
    %c0_7 = arith.constant 0 : index
    %c0_8 = arith.constant 0 : index
    %11 = vector.load %arg4[%c0_7, %c0_8] : memref<64x64xbf16, #tpu.memory_space<vmem>>, vector<64x64xbf16>
    %cst_9 = arith.constant dense<0.000000e+00> : vector<128x64xf32>
    %12 = tpu.matmul %10, %11, %cst_9 {dimension_numbers = #tpu.dot_dimension_numbers<[1], [0], [0], [1], [0, 0, 1, 1], [], []>} : vector<128x64xbf16>, vector<64x64xbf16>, vector<128x64xf32> -> vector<128x64xf32>
    %c0_10 = arith.constant 0 : index
    %c0_11 = arith.constant 0 : index
    %13 = vector.load %arg5[%c0_10, %c0_11] : memref<1x64xf32, #tpu.memory_space<vmem>>, vector<1x64xf32>
    %14 = vector.broadcast %13 : vector<1x64xf32> to vector<128x64xf32>
    %15 = arith.addf %12, %14 : vector<128x64xf32>
    %cst_12 = arith.constant 0.000000e+00 : f32
    %16 = vector.broadcast %cst_12 : f32 to vector<128x64xf32>
    %17 = arith.maximumf %15, %16 : vector<128x64xf32>
    %18 = arith.truncf %17 : vector<128x64xf32> to vector<128x64xbf16>
    %c0_13 = arith.constant 0 : index
    %c0_14 = arith.constant 0 : index
    %19 = vector.load %arg6[%c0_13, %c0_14] : memref<64x64xbf16, #tpu.memory_space<vmem>>, vector<64x64xbf16>
    %cst_15 = arith.constant dense<0.000000e+00> : vector<128x64xf32>
    %20 = tpu.matmul %18, %19, %cst_15 {dimension_numbers = #tpu.dot_dimension_numbers<[1], [0], [0], [1], [0, 0, 1, 1], [], []>} : vector<128x64xbf16>, vector<64x64xbf16>, vector<128x64xf32> -> vector<128x64xf32>
    %c0_16 = arith.constant 0 : index
    %c0_17 = arith.constant 0 : index
    %21 = vector.load %arg7[%c0_16, %c0_17] : memref<1x64xf32, #tpu.memory_space<vmem>>, vector<1x64xf32>
    %22 = vector.broadcast %21 : vector<1x64xf32> to vector<128x64xf32>
    %23 = arith.addf %20, %22 : vector<128x64xf32>
    %cst_18 = arith.constant 0.000000e+00 : f32
    %24 = vector.broadcast %cst_18 : f32 to vector<128x64xf32>
    %25 = arith.maximumf %23, %24 : vector<128x64xf32>
    %26 = arith.truncf %25 : vector<128x64xf32> to vector<128x64xbf16>
    %c0_19 = arith.constant 0 : index
    %c0_20 = arith.constant 0 : index
    %27 = vector.load %arg8[%c0_19, %c0_20] : memref<64x128xbf16, #tpu.memory_space<vmem>>, vector<64x128xbf16>
    %cst_21 = arith.constant dense<0.000000e+00> : vector<128x128xf32>
    %28 = tpu.matmul %26, %27, %cst_21 {dimension_numbers = #tpu.dot_dimension_numbers<[1], [0], [0], [1], [0, 0, 1, 1], [], []>} : vector<128x64xbf16>, vector<64x128xbf16>, vector<128x128xf32> -> vector<128x128xf32>
    %c0_22 = arith.constant 0 : index
    %c0_23 = arith.constant 0 : index
    %29 = vector.load %arg9[%c0_22, %c0_23] : memref<1x128xf32, #tpu.memory_space<vmem>>, vector<1x128xf32>
    %30 = vector.broadcast %29 : vector<1x128xf32> to vector<128x128xf32>
    %31 = arith.addf %28, %30 : vector<128x128xf32>
    %cst_24 = arith.constant 0.000000e+00 : f32
    %32 = vector.broadcast %cst_24 : f32 to vector<128x128xf32>
    %33 = arith.maximumf %31, %32 : vector<128x128xf32>
    %34 = arith.truncf %33 : vector<128x128xf32> to vector<128x128xbf16>
    %c0_25 = arith.constant 0 : index
    %c0_26 = arith.constant 0 : index
    %35 = vector.load %arg10[%c0_25, %c0_26] : memref<128x64xbf16, #tpu.memory_space<vmem>>, vector<128x64xbf16>
    %cst_27 = arith.constant dense<0.000000e+00> : vector<128x64xf32>
    %36 = tpu.matmul %34, %35, %cst_27 {dimension_numbers = #tpu.dot_dimension_numbers<[1], [0], [0], [1], [0, 0, 1, 1], [], []>} : vector<128x128xbf16>, vector<128x64xbf16>, vector<128x64xf32> -> vector<128x64xf32>
    %c0_28 = arith.constant 0 : index
    %c0_29 = arith.constant 0 : index
    %37 = vector.load %arg11[%c0_28, %c0_29] : memref<1x64xf32, #tpu.memory_space<vmem>>, vector<1x64xf32>
    %38 = vector.broadcast %37 : vector<1x64xf32> to vector<128x64xf32>
    %39 = arith.addf %36, %38 : vector<128x64xf32>
    %cst_30 = arith.constant 0.000000e+00 : f32
    %40 = vector.broadcast %cst_30 : f32 to vector<128x64xf32>
    %41 = arith.maximumf %39, %40 : vector<128x64xf32>
    %42 = vector.shape_cast %41 : vector<128x64xf32> to vector<1x128x64xf32>
    %cst_31 = arith.constant dense<0xFF800000> : vector<1x64xf32>
    %43 = vector.multi_reduction <maximumf>, %42, %cst_31 [1] : vector<1x128x64xf32> to vector<1x64xf32>
    %cst_32 = arith.constant dense<0.000000e+00> : vector<1x64xf32>
    %44 = vector.multi_reduction <add>, %42, %cst_32 [1] : vector<1x128x64xf32> to vector<1x64xf32>
    %cst_33 = arith.constant 7.812500e-03 : f32
    %45 = vector.broadcast %cst_33 : f32 to vector<1x64xf32>
    %46 = arith.mulf %44, %45 : vector<1x64xf32>
    %47 = tpu.concatenate %43, %46 in 1 : vector<1x64xf32>, vector<1x64xf32> -> vector<1x128xf32>
    %48 = arith.truncf %47 : vector<1x128xf32> to vector<1x128xbf16>
    %c0_34 = arith.constant 0 : index
    %c0_35 = arith.constant 0 : index
    %49 = vector.load %arg12[%c0_34, %c0_35] : memref<128x512xbf16, #tpu.memory_space<vmem>>, vector<128x512xbf16>
    %cst_36 = arith.constant dense<0.000000e+00> : vector<1x512xf32>
    %50 = tpu.matmul %48, %49, %cst_36 {dimension_numbers = #tpu.dot_dimension_numbers<[1], [0], [0], [1], [0, 0, 1, 1], [], []>} : vector<1x128xbf16>, vector<128x512xbf16>, vector<1x512xf32> -> vector<1x512xf32>
    %c0_37 = arith.constant 0 : index
    %c0_38 = arith.constant 0 : index
    %51 = vector.load %arg13[%c0_37, %c0_38] : memref<1x512xf32, #tpu.memory_space<vmem>>, vector<1x512xf32>
    %52 = arith.addf %50, %51 : vector<1x512xf32>
    %cst_39 = arith.constant 0.000000e+00 : f32
    %53 = vector.broadcast %cst_39 : f32 to vector<1x512xf32>
    %54 = arith.cmpf ogt, %52, %53 : vector<1x512xf32>
    %cst_40 = arith.constant 2.000000e-01 : f32
    %55 = vector.broadcast %cst_40 : f32 to vector<1x512xf32>
    %56 = arith.mulf %55, %52 : vector<1x512xf32>
    %57 = arith.select %54, %52, %56 : vector<1x512xi1>, vector<1x512xf32>
    %58 = arith.truncf %57 : vector<1x512xf32> to vector<1x512xbf16>
    %c0_41 = arith.constant 0 : index
    %c0_42 = arith.constant 0 : index
    %59 = vector.load %arg14[%c0_41, %c0_42] : memref<512x256xbf16, #tpu.memory_space<vmem>>, vector<512x256xbf16>
    %cst_43 = arith.constant dense<0.000000e+00> : vector<1x256xf32>
    %60 = tpu.matmul %58, %59, %cst_43 {dimension_numbers = #tpu.dot_dimension_numbers<[1], [0], [0], [1], [0, 0, 1, 1], [], []>} : vector<1x512xbf16>, vector<512x256xbf16>, vector<1x256xf32> -> vector<1x256xf32>
    %c0_44 = arith.constant 0 : index
    %c0_45 = arith.constant 0 : index
    %61 = vector.load %arg15[%c0_44, %c0_45] : memref<1x256xf32, #tpu.memory_space<vmem>>, vector<1x256xf32>
    %62 = arith.addf %60, %61 : vector<1x256xf32>
    %cst_46 = arith.constant 0.000000e+00 : f32
    %63 = vector.broadcast %cst_46 : f32 to vector<1x256xf32>
    %64 = arith.cmpf ogt, %62, %63 : vector<1x256xf32>
    %cst_47 = arith.constant 2.000000e-01 : f32
    %65 = vector.broadcast %cst_47 : f32 to vector<1x256xf32>
    %66 = arith.mulf %65, %62 : vector<1x256xf32>
    %67 = arith.select %64, %62, %66 : vector<1x256xi1>, vector<1x256xf32>
    %68 = arith.truncf %67 : vector<1x256xf32> to vector<1x256xbf16>
    %c0_48 = arith.constant 0 : index
    %c0_49 = arith.constant 0 : index
    %69 = vector.load %arg16[%c0_48, %c0_49] : memref<256x128xbf16, #tpu.memory_space<vmem>>, vector<256x128xbf16>
    %cst_50 = arith.constant dense<0.000000e+00> : vector<1x128xf32>
    %70 = tpu.matmul %68, %69, %cst_50 {dimension_numbers = #tpu.dot_dimension_numbers<[1], [0], [0], [1], [0, 0, 1, 1], [], []>} : vector<1x256xbf16>, vector<256x128xbf16>, vector<1x128xf32> -> vector<1x128xf32>
    %c0_51 = arith.constant 0 : index
    %c0_52 = arith.constant 0 : index
    %71 = vector.load %arg17[%c0_51, %c0_52] : memref<1x128xf32, #tpu.memory_space<vmem>>, vector<1x128xf32>
    %72 = arith.addf %70, %71 : vector<1x128xf32>
    %73 = vector.shape_cast %72 : vector<1x128xf32> to vector<1x1x128xf32>
    %c0_53 = arith.constant 0 : index
    %c0_54 = arith.constant 0 : index
    %c0_55 = arith.constant 0 : index
    %74 = vector.load %arg18[%c0_53, %c0_54, %c0_55] : memref<1x1x128xf32, #tpu.memory_space<vmem>>, vector<1x1x128xf32>
    tpu.vector_store %arg18[%c0_53, %c0_54, %c0_55], %73 {strides = array<i32>} : memref<1x1x128xf32, #tpu.memory_space<vmem>>, vector<1x1x128xf32>,
    return
  }
  func.func @transform_0(%arg0: i32) -> (i32, i32, i32) {
    %c0_i32 = arith.constant 0 : i32
    %c0_i32_0 = arith.constant 0 : i32
    %c0_i32_1 = arith.constant 0 : i32
    return %arg0, %c0_i32, %c0_i32_0 : i32, i32, i32
  }
  func.func @transform_1(%arg0: i32) -> (i32, i32) {
    %c0_i32 = arith.constant 0 : i32
    %c0_i32_0 = arith.constant 0 : i32
    %c0_i32_1 = arith.constant 0 : i32
    return %c0_i32, %c0_i32_0 : i32, i32
  }
  func.func @transform_2(%arg0: i32) -> (i32, i32) {
    %c0_i32 = arith.constant 0 : i32
    %c0_i32_0 = arith.constant 0 : i32
    %c0_i32_1 = arith.constant 0 : i32
    return %c0_i32, %c0_i32_0 : i32, i32
  }
  func.func @transform_3(%arg0: i32) -> (i32, i32) {
    %c0_i32 = arith.constant 0 : i32
    %c0_i32_0 = arith.constant 0 : i32
    %c0_i32_1 = arith.constant 0 : i32
    return %c0_i32, %c0_i32_0 : i32, i32
  }
  func.func @transform_4(%arg0: i32) -> (i32, i32) {
    %c0_i32 = arith.constant 0 : i32
    %c0_i32_0 = arith.constant 0 : i32
    %c0_i32_1 = arith.constant 0 : i32
    return %c0_i32, %c0_i32_0 : i32, i32
  }
  func.func @transform_5(%arg0: i32) -> (i32, i32) {
    %c0_i32 = arith.constant 0 : i32
    %c0_i32_0 = arith.constant 0 : i32
    %c0_i32_1 = arith.constant 0 : i32
    return %c0_i32, %c0_i32_0 : i32, i32
  }
  func.func @transform_6(%arg0: i32) -> (i32, i32) {
    %c0_i32 = arith.constant 0 : i32
    %c0_i32_0 = arith.constant 0 : i32
    %c0_i32_1 = arith.constant 0 : i32
    return %c0_i32, %c0_i32_0 : i32, i32
  }
  func.func @transform_7(%arg0: i32) -> (i32, i32) {
    %c0_i32 = arith.constant 0 : i32
    %c0_i32_0 = arith.constant 0 : i32
    %c0_i32_1 = arith.constant 0 : i32
    return %c0_i32, %c0_i32_0 : i32, i32
  }
  func.func @transform_8(%arg0: i32) -> (i32, i32) {
    %c0_i32 = arith.constant 0 : i32
    %c0_i32_0 = arith.constant 0 : i32
    %c0_i32_1 = arith.constant 0 : i32
    return %c0_i32, %c0_i32_0 : i32, i32
  }
  func.func @transform_9(%arg0: i32) -> (i32, i32) {
    %c0_i32 = arith.constant 0 : i32
    %c0_i32_0 = arith.constant 0 : i32
    %c0_i32_1 = arith.constant 0 : i32
    return %c0_i32, %c0_i32_0 : i32, i32
  }
  func.func @transform_10(%arg0: i32) -> (i32, i32) {
    %c0_i32 = arith.constant 0 : i32
    %c0_i32_0 = arith.constant 0 : i32
    %c0_i32_1 = arith.constant 0 : i32
    return %c0_i32, %c0_i32_0 : i32, i32
  }
  func.func @transform_11(%arg0: i32) -> (i32, i32) {
    %c0_i32 = arith.constant 0 : i32
    %c0_i32_0 = arith.constant 0 : i32
    %c0_i32_1 = arith.constant 0 : i32
    return %c0_i32, %c0_i32_0 : i32, i32
  }
  func.func @transform_12(%arg0: i32) -> (i32, i32) {
    %c0_i32 = arith.constant 0 : i32
    %c0_i32_0 = arith.constant 0 : i32
    %c0_i32_1 = arith.constant 0 : i32
    return %c0_i32, %c0_i32_0 : i32, i32
  }
  func.func @transform_13(%arg0: i32) -> (i32, i32) {
    %c0_i32 = arith.constant 0 : i32
    %c0_i32_0 = arith.constant 0 : i32
    %c0_i32_1 = arith.constant 0 : i32
    return %c0_i32, %c0_i32_0 : i32, i32
  }
  func.func @transform_14(%arg0: i32) -> (i32, i32) {
    %c0_i32 = arith.constant 0 : i32
    %c0_i32_0 = arith.constant 0 : i32
    %c0_i32_1 = arith.constant 0 : i32
    return %c0_i32, %c0_i32_0 : i32, i32
  }
  func.func @transform_15(%arg0: i32) -> (i32, i32) {
    %c0_i32 = arith.constant 0 : i32
    %c0_i32_0 = arith.constant 0 : i32
    %c0_i32_1 = arith.constant 0 : i32
    return %c0_i32, %c0_i32_0 : i32, i32
  }
  func.func @transform_16(%arg0: i32) -> (i32, i32) {
    %c0_i32 = arith.constant 0 : i32
    %c0_i32_0 = arith.constant 0 : i32
    %c0_i32_1 = arith.constant 0 : i32
    return %c0_i32, %c0_i32_0 : i32, i32
  }
  func.func @transform_17(%arg0: i32) -> (i32, i32, i32) {
    %c0_i32 = arith.constant 0 : i32
    %c0_i32_0 = arith.constant 0 : i32
    %c0_i32_1 = arith.constant 0 : i32
    return %arg0, %c0_i32, %c0_i32_0 : i32, i32, i32
  }
}

</mosaic_0001>

<bundles_post_ra>
// kernel: tpu_custom_call.1
= control target key start
LH: loop header
LB: loop body
LE: loop exit
PB: predicated region body
PF: predicated region fallthrough
CT: control target
= control target key end

     0   :  { %s4294_s0 = inlined_call_operand.vmem [shape: f32[2,128,3], index: 0, kind: input, shape index: {}]   ;;  %s4295_s1 = inlined_call_operand.hbm [shape: bf16[3,64], index: 1, kind: input, shape index: {}]   ;;  %s4296_s2 = inlined_call_operand.hbm [shape: f32[1,64], index: 2, kind: input, shape index: {}]   ;;  %s4297_s3 = inlined_call_operand.vmem [shape: bf16[64,64], index: 3, kind: input, shape index: {}]   ;;  %s4298_s4 = inlined_call_operand.vmem [shape: f32[1,64], index: 4, kind: input, shape index: {}]   ;;  %s4299_s5 = inlined_call_operand.vmem [shape: bf16[64,64], index: 5, kind: input, shape index: {}]   ;;  %s4300_s6 = inlined_call_operand.hbm [shape: f32[1,64], index: 6, kind: input, shape index: {}]   ;;  %s4301_s7 = inlined_call_operand.vmem [shape: bf16[64,128], index: 7, kind: input, shape index: {}]   ;;  %s4302_s8 = inlined_call_operand.hbm [shape: f32[1,128], index: 8, kind: input, shape index: {}]   ;;  %s4303_s9 = inlined_call_operand.vmem [shape: bf16[128,64], index: 9, kind: input, shape index: {}]   ;;  %s4304_s10 = inlined_call_operand.hbm [shape: f32[1,64], index: 10, kind: input, shape index: {}]   ;;  %s4305_s11 = inlined_call_operand.vmem [shape: bf16[128,512], index: 11, kind: input, shape index: {}]   ;;  %s4306_s12 = inlined_call_operand.vmem [shape: f32[1,512], index: 12, kind: input, shape index: {}]   ;;  %s4307_s13 = inlined_call_operand.hbm [shape: bf16[512,256], index: 13, kind: input, shape index: {}]   ;;  %s4308_s14 = inlined_call_operand.vmem [shape: f32[1,256], index: 14, kind: input, shape index: {}]   ;;  %s4309_s15 = inlined_call_operand.hbm [shape: bf16[256,128], index: 15, kind: input, shape index: {}]   ;;  %s4310_s16 = inlined_call_operand.vmem [shape: f32[1,128], index: 16, kind: input, shape index: {}]   ;;  %s4311_s17 = inlined_call_operand.hbm [shape: f32[2,1,128], index: 17, kind: output, shape index: {}]  }
   0x1   :  { %4321 = sst [smem:[#allocation27_spill]] %s4294_s0 }
   0x2   :  { %4322 = sst [smem:[#allocation28_spill]] %s4295_s1 }
   0x3   :  { %4323 = sst [smem:[#allocation29_spill]] %s4296_s2 }
   0x4   :  { %4324 = sst [smem:[#allocation30_spill]] %s4302_s8 }
   0x5   :  { %4325 = sst [smem:[#allocation31_spill]] %s4310_s16 }
   0x6   :  { %4326 = sst [smem:[#allocation32_spill]] %s4311_s17 }
   0x7   :  { %22 = vsyncpa [#allocation3], 0 }
   0x8   :  { %23 = vsyncpa [#allocation6], 0 }
   0x9   :  { %24 = vsyncpa [#allocation9], 0 }
   0xa   :  { %25 = vsyncpa [#allocation12], 0 }
   0xb   :  { %26 = vsyncpa [#allocation4], 0 }
   0xc   :  { %28 = vsyncpa [#allocation4 + $0x1], 0  ;;  %s3699_s24 = smov 0   ;;  %s3701_s25 = smov 0  }
   0xd   :  { %s3703_s26 = smov 0   ;;  %s3705_s27 = smov 0  }
   0xe LB: > { %4327 = sst [smem:[#allocation20_spill]] %s3582_s24  ;;  %s3720_s28 = sadd.s32 4294967295, %s3594_s27   ;;  %s3594_s27 = sphi %s3705_s27, %s4348_s27   ;;  %s3590_s26 = sphi %s3703_s26, %s4350_s26   ;;  %s3586_s25 = sphi %s3701_s25, %s4352_s25   ;;  %s3582_s24 = sphi %s3699_s24, %s4351_s24  }
   0xf   : > { %4328 = sst [smem:[#allocation21_spill]] %s3590_s26  ;;  %s2466_s29 = sadd.s32 4294967294, %s3594_s27  }
  0x10   : > { %4329 = sst [smem:[#allocation22_spill]] %s3594_s27  ;;  %s3724_s0 = sadd.s32 1, %s3594_s27  }
  0x11   : > { %4330 = sst [smem:[#allocation23_spill]] %s3724_s0  ;;  %s403_s30 = sadd.s32 1, %s3590_s26 }
  0x12   : > { %s400_s18 = ssub.s32 %s3594_s27, %s3724_s0  ;;  %p413_p0 = scmp.ne.s32.totalorder %s3590_s26, %s3586_s25 }
  0x13   : > { %p401_p1 = scmp.eq.s32.totalorder %s400_s18, 0  ;;  %p414_p2 = scmp.eq.s32.totalorder %s3720_s28, 1 }
  0x14   : > { %p419_p3 = scmp.ne.s32.totalorder %s3586_s25, %s3582_s24  ;;  %p420_p4 = scmp.eq.s32.totalorder %s2466_s29, 1 }
  0x15   : > { %s3735_s19 = scalar_select %p401_p1, %s3590_s26, %s403_s30  }
  0x16   : > { %p3737_p5 = por %p414_p2, %p413_p0  ;;  %p3741_p6 = por %p420_p4, %p419_p3 }
  0x17   : > { %4331 = sst [smem:[#allocation24_spill]] %s3735_s19  ;;  %p2467_p7 = scmp.ge.s32.totalorder %s3594_s27, 1 }
  0x18   : > { %s4332_s1 = scalar_select %p3737_p5, 1, 0 }
  0x19   : > { %s4334_s20 = scalar_select %p3741_p6, 1, 0 }
  0x1a   : > { %4333 = sst [smem:[#allocation25_spill]] %s4332_s1  ;;  %p427_p8 = scmp.lt.s32.totalorder %s3594_s27, 3 }
  0x1b   : > { %4335 = sst [smem:[#allocation26_spill]] %s4334_s20  ;;  %p3241_p9 = scmp.eq.s32.totalorder %s3720_s28, 0 }
  0x1c   : > { %p3748_p10 = pnand %p2467_p7, %p427_p8  ;;  %s4337_s2 = sld [smem:[#allocation29_spill]] }
  0x1d   : > { %s3596_s30 = smov [#allocation5]   ;;  %s4338_s8 = sld [smem:[#allocation30_spill]] }
  0x1e   : > { %p3215_p11 = pneg %p3748_p10  ;;  %s453_s18 = sshll.u32 %s3596_s30, 4  ;;  %s454_s18 = int_to_ptr.vmem [resolvable:$true] %s453_s18 }
  0x1f   : > { %s3597_s24 = smov [#allocation8]   ;;  %s3598_s26 = smov [#allocation11]  }
  0x20   : > { %p3762_p12 = pnand %p3241_p9, %p3215_p11  ;;  %s489_s30 = sshll.u32 %s3597_s24, 4  ;;  %s490_s30 = int_to_ptr.vmem [resolvable:$true] %s489_s30 }
  0x21   : > { %s521_s19 = sshll.u32 %s3598_s26, 4  ;;  %s4340_s1 = sld [smem:[#allocation28_spill]]  ;;  %s522_s19 = int_to_ptr.vmem [resolvable:$true] %s521_s19 }
  0x22   : > { %s451_s29 = sshll.u32 %s4337_s2, 4  ;;  %s519_s2 = sshll.u32 %s4307_s13, 4  ;;  %s452_s29 = int_to_ptr.hbm [resolvable:$true] %s451_s29  ;;  %s520_s2 = int_to_ptr.hbm [resolvable:$true] %s519_s2 }
  0x23   : > { %s487_s0 = sshll.u32 %s4338_s8, 4  ;;  %s3599_s17 = smov 128   ;;  %s488_s0 = int_to_ptr.hbm [resolvable:$true] %s487_s0 }
  0x24   : > { %3221 = dma.hbm_to_vmem [thread:$0]  (!%p3762_p12), %s452_s29, 16, %s454_s18, [#allocation6]  }
  0x25   : > { %3227 = dma.hbm_to_vmem [thread:$0]  (!%p3762_p12), %s488_s0, 16, %s490_s30, [#allocation9]  }
  0x26   : > { %s3600_s22 = smov 8   ;;  %s3601_s24 = smov [#allocation2]  }
  0x27   : > { %s439_s16 = sshll.u32 %s4340_s1, 4  ;;  %s441_s29 = sshll.u32 %s3601_s24, 4  ;;  %s440_s16 = int_to_ptr.hbm [resolvable:$true] %s439_s16  ;;  %s442_s29 = int_to_ptr.vmem [resolvable:$true] %s441_s29 }
  0x28   : > { %3233 = dma.hbm_to_vmem [thread:$0]  (!%p3762_p12), %s520_s2, 8192, %s522_s19, [#allocation12], %s3599_s17, %s3599_s17, %s3600_s22  }
  0x29   : > { %s472_s0 = sshll.u32 %s4300_s6, 4  ;;  %s502_s27 = sshll.u32 %s4304_s10, 4  ;;  %s473_s0 = int_to_ptr.hbm [resolvable:$true] %s472_s0  ;;  %s503_s27 = int_to_ptr.hbm [resolvable:$true] %s502_s27 }
  0x2a   : > { %3218 = dma.hbm_to_vmem [thread:$0]  (!%p3762_p12), %s440_s16, 32, %s442_s29, [#allocation3]  }
  0x2b   : > { %s3602_s1 = smov [#allocation7]   ;;  %s3603_s2 = smov [#allocation10]  }
  0x2c   : > { %s474_s26 = sshll.u32 %s3602_s1, 4  ;;  %s504_s17 = sshll.u32 %s3603_s2, 4  ;;  %s475_s26 = int_to_ptr.vmem [resolvable:$true] %s474_s26  ;;  %s505_s17 = int_to_ptr.vmem [resolvable:$true] %s504_s17 }
  0x2d   : > { %3224 = dma.hbm_to_vmem [thread:$0]  (!%p3762_p12), %s473_s0, 16, %s475_s26, [#allocation6]  }
  0x2e   : > { %s536_s24 = sshll.u32 %s4309_s15, 4  ;;  %s3604_s16 = smov [#allocation13]   ;;  %s537_s24 = int_to_ptr.hbm [resolvable:$true] %s536_s24 }
  0x2f   : > { %3230 = dma.hbm_to_vmem [thread:$0]  (!%p3762_p12), %s503_s27, 16, %s505_s17, [#allocation9]  }
  0x30   : > { %s538_s29 = sshll.u32 %s3604_s16, 4  ;;  %s3605_s18 = smov 64   ;;  %s539_s29 = int_to_ptr.vmem [resolvable:$true] %s538_s29 }
  0x31   : > { %s3606_s23 = smov 4   ;;  %565 = sbr.rel (%p3748_p10) target bundleno = 1479 (0x5c7), region = 88 }
  0x32   : > { %3236 = dma.hbm_to_vmem [thread:$0]  (!%p3762_p12), %s537_s24, 2048, %s539_s29, [#allocation12], %s3605_s18, %s3605_s18, %s3606_s23  }
  0x36   : > { %3561 = dma.done.wait (%p3241_p9), [#allocation3], 32  }
  0x37   : > { %3563 = vsyncadd (%p3241_p9), [#allocation3], 4294967264 }
  0x38   : > { %3565 = dma.done.wait (%p3241_p9), [#allocation6], 32  }
  0x39   : > { %3567 = vsyncadd (%p3241_p9), [#allocation6], 4294967264 }
  0x3a   : > { %3569 = dma.done.wait (%p3241_p9), [#allocation9], 32  }
  0x3b   : > { %3571 = vsyncadd (%p3241_p9), [#allocation9], 4294967264 }
  0x3c   : > { %3573 = dma.done.wait (%p3241_p9), [#allocation12], 10240  }
  0x3d   : > { %3575 = vsyncadd (%p3241_p9), [#allocation12], 4294957056  ;;  %vm707_vm0 = vcmask 1040384   ;;  %p647_p13 = scmp.lt.s32.totalorder %s3720_s28, 1  ;;  %vm708_vm1 = vcmask 1041408   ;;  %v3607_v0 = vmov 65535  }
  0x3e   : > { %v709_v1 = vsel %vm707_vm0, 4294967295, %v3607_v0  ;;  %s4341_s8 = sld [smem:[#allocation27_spill]]  ;;  %v677_v3 = vld [vmem:[#allocation2] sm:$0x3]  ;;  %vm682_vm2 = vcmask 23552   ;;  %v3052_v25 = vld [vmem:[%s4297_s3 + $0x18] sm:$0xff] }
  0x3f   : > { %s648_s20 = scalar_select %p647_p13, %s3720_s28, 1  ;;  %v710_v2 = vsel %vm708_vm1, %v709_v1, 0  ;;  %852 = vmatpush.bf16.msra.mxu1 %v3052_v25  ;;  %3181 = vmatpush.bf16.msra.mxu2 %v3052_v25  ;;  %v3051_v27 = vld [vmem:[%s4297_s3 + $0x10] sm:$0xff]  ;;  %v3050_v28 = vld [vmem:[%s4297_s3 + $0x8] sm:$0xff]  ;;  %v3049_v29 = vld [vmem:[%s4297_s3] sm:$0xff]  ;;  %vm823_vm3 = vcmask 523264  }
  0x40   : > { %v712_v6 = vand.u32 %v710_v2, %v677_v3  ;;  %v3856_v34 = vld [vmem:[#allocation5] ss:$0 sm:$0xff]  ;;  %s3608_s24 = smov 64   ;;  %s645_s22 = sand.u32 1, %s3586_s25  }
  0x41   : > { %s3048_s21 = sshll.u32 %s648_s20, 7  ;;  %s4342_s29 = sld [smem:[#allocation32_spill]] }
  0x42   : > { %721 = vmatpush.bf16.msra.mxu0 %v712_v6  ;;  %s646_s30 = scalar_lea.vmem [#allocation14], %s645_s22  ;;  %s2330_s1 = scalar_lea.sflag [#allocation4], %s645_s22 }
  0x43   : > { %853 = vmatpush.bf16.msra.mxu1 %v3051_v27  ;;  %3182 = vmatpush.bf16.msra.mxu2 %v3051_v27 }
  0x44   : > { %s3818_s27 = scalar_lea.vmem %s4341_s8, %s3048_s21  ;;  %s4343_s21 = sld [smem:[#allocation31_spill]] }
  0x45   : > { %v653_v4 = vld [vmem:[%s3818_s27] sm:$0xff]  ;;  %v654_v5 = vld [vmem:[%s3818_s27 + $0x8] sm:$0xff]  ;;  %v655_v8 = vld [vmem:[%s3818_s27 + $0x10] sm:$0xff]  ;;  %s2340_s8 = sshll.u32 %s646_s30, 4  ;;  %s2341_s8 = int_to_ptr.vmem [resolvable:$true] %s2340_s8 }
  0x46   : > { %v669_v7 = vpack.c.bf16 %v654_v5, %v653_v4  ;;  %v656_v9 = vld [vmem:[%s3818_s27 + $0x18] sm:$0xff]  ;;  %v657_v11 = vld [vmem:[%s3818_s27 + $0x20] sm:$0xff]  ;;  %v658_v12 = vld [vmem:[%s3818_s27 + $0x28] sm:$0xff] }
  0x47   : > { %v670_v10 = vpack.c.bf16 %v656_v9, %v655_v8  ;;  %v671_v13 = vpack.c.bf16 %v658_v12, %v657_v11  ;;  %v659_v14 = vld [vmem:[%s3818_s27 + $0x30] sm:$0xff]  ;;  %v660_v15 = vld [vmem:[%s3818_s27 + $0x38] sm:$0xff]  ;;  %v661_v17 = vld [vmem:[%s3818_s27 + $0x40] sm:$0xff]  ;;  %854 = vmatpush.bf16.msra.mxu1 %v3050_v28  ;;  %3183 = vmatpush.bf16.msra.mxu2 %v3050_v28  ;;  %s2338_s18 = scalar_lea.hbm %s4342_s29, %s3720_s28  ;;  %s3536_s19 = scalar_lea.hbm %s4342_s29, 2 }
  0x48   : > { %2486 = vmatmul.msk.bf16.vlgmr.msra.gmra.mxu0 %vm682_vm2, %v669_v7  ;;  %v672_v16 = vpack.c.bf16 %v660_v15, %v659_v14  ;;  %v662_v18 = vld [vmem:[%s3818_s27 + $0x48] sm:$0xff]  ;;  %v663_v20 = vld [vmem:[%s3818_s27 + $0x50] sm:$0xff]  ;;  %v664_v21 = vld [vmem:[%s3818_s27 + $0x58] sm:$0xff] }
  0x49   : > { %v673_v19 = vpack.c.bf16 %v662_v18, %v661_v17  ;;  %v674_v22 = vpack.c.bf16 %v664_v21, %v663_v20  ;;  %v665_v23 = vld [vmem:[%s3818_s27 + $0x60] sm:$0xff]  ;;  %v666_v24 = vld [vmem:[%s3818_s27 + $0x68] sm:$0xff]  ;;  %v667_v30 = vld [vmem:[%s3818_s27 + $0x70] sm:$0xff] }
  0x4a   : > { %v675_v26 = vpack.c.bf16 %v666_v24, %v665_v23  ;;  %v668_v31 = vld [vmem:[%s3818_s27 + $0x78] sm:$0xff]  ;;  %v3055_v20 = vld [vmem:[%s4299_s5 + $0x10] sm:$0xff]  ;;  %v3053_v23 = vld [vmem:[%s4299_s5] sm:$0xff]  ;;  %s2342_s27 = sshll.u32 %s2338_s18, 4  ;;  %s2343_s27 = int_to_ptr.hbm [resolvable:$true] %s2342_s27 }
  0x4b   : > { %855 = vmatpush.bf16.msra.mxu1 %v3049_v29  ;;  %3184 = vmatpush.bf16.msra.mxu2 %v3049_v29  ;;  %v676_v32 = vpack.c.bf16 %v668_v31, %v667_v30  ;;  %v3897_v31 = vld [vmem:[%s4298_s4] ss:$0 sm:$0xff]  ;;  %s3530_s26 = sshra.s32 %s2343_s27, 4  ;;  %s3531_s26 = int_to_ptr.hbm [resolvable:$true] %s3530_s26 }
  0x4c   : > { %s3532_s2 = scalar_lea.hbm %s3531_s26, 1  ;;  %p3537_p3 = scmp.lt.s32.totalorder %s3531_s26, %s4342_s29 }
  0x4d   : > { %p3533_p0 = scmp.ne.s32.totalorder %s3531_s26, %s3532_s2  ;;  %p3538_p4 = scmp.lt.s32.totalorder %s3536_s19, %s3532_s2 }
  0x4f   : > { %p3534_p1 = pnand %p3533_p0, %p3737_p5  ;;  %p3539_p7 = por %p3538_p4, %p3537_p3 }
  0x51   : > { %p3535_p2 = pneg %p3534_p1 }
  0x53   : > { %p3540_p8 = pnand %p3539_p7, %p3535_p2 }
  0x58   : > { %2487 = vmatmul.msk.bf16.gmra.mxu0 %vm682_vm2, %v670_v10 }
  0x68   : > { %2488 = vmatmul.msk.bf16.gmra.mxu0 %vm682_vm2, %v671_v13 }
  0x78   : > { %2489 = vmatmul.msk.bf16.gmra.mxu0 %vm682_vm2, %v672_v16  ;;  %v3056_v16 = vld [vmem:[%s4299_s5 + $0x18] sm:$0xff] }
  0x79   : > { %985 = vmatpush.bf16.msrb.mxu2 %v3056_v16  ;;  %v3060_v16 = vld [vmem:[%s4301_s7 + $0x18] sm:$0xff] }
  0x7a   : > { %1118 = vmatpush.bf16.msra.mxu3 %v3060_v16 }
  0x7d   : > { %986 = vmatpush.bf16.msrb.mxu2 %v3055_v20  ;;  %v3057_v20 = vld [vmem:[%s4301_s7] sm:$0xff] }
  0x88   : > { %2490 = vmatmul.msk.bf16.gmra.mxu0 %vm682_vm2, %v673_v19 }
  0x98   : > { %2491 = vmatmul.msk.bf16.gmra.mxu0 %vm682_vm2, %v674_v22  ;;  %v3054_v22 = vld [vmem:[%s4299_s5 + $0x8] sm:$0xff] }
  0x99   : > { %987 = vmatpush.bf16.msrb.mxu2 %v3054_v22 }
  0x9d   : > { %988 = vmatpush.bf16.msrb.mxu2 %v3053_v23 }
  0xa8   : > { %2492 = vmatmul.msk.bf16.gmra.mxu0 %vm682_vm2, %v675_v26 }
  0xb8   : > { %2493 = vmatmul.msk.bf16.gmra.mxu0 %vm682_vm2, %v676_v32 }
  0xc5   : > { %v723_v33 = vpop.f32.mrf.mxu0 }
  0xc6   : > { %v724_v35 = vadd.f32 %v3856_v34, %v723_v33 }
  0xc8   : > { %v763_v38 = vmax.f32 %v724_v35, 0.0 }
  0xcd   : > { %v725_v36 = vpop.f32.mrf.mxu0 }
  0xce   : > { %v726_v37 = vadd.f32 %v3856_v34, %v725_v36 }
  0xd0   : > { %v764_v39 = vmax.f32 %v726_v37, 0.0 }
  0xd2   : > { %v779_v40 = vpack.c.bf16 %v764_v39, %v763_v38 }
  0xd4   : > { %2510 = vmatmul.msk.bf16.vlgmr.msra.gmra.mxu1 %vm823_vm3, %v779_v40 }
  0xd5   : > { %v728_v41 = vpop.f32.mrf.mxu0 }
  0xd6   : > { %v729_v42 = vadd.f32 %v3856_v34, %v728_v41 }
  0xd8   : > { %v765_v45 = vmax.f32 %v729_v42, 0.0 }
  0xdd   : > { %v730_v43 = vpop.f32.mrf.mxu0 }
  0xde   : > { %v731_v44 = vadd.f32 %v3856_v34, %v730_v43 }
  0xe0   : > { %v766_v46 = vmax.f32 %v731_v44, 0.0 }
  0xe2   : > { %v780_v47 = vpack.c.bf16 %v766_v46, %v765_v45 }
  0xe4   : > { %2511 = vmatmul.msk.bf16.gmra.mxu1 %vm823_vm3, %v780_v47 }
  0xe5   : > { %v733_v48 = vpop.f32.mrf.mxu0 }
  0xe6   : > { %v734_v49 = vadd.f32 %v3856_v34, %v733_v48 }
  0xe8   : > { %v767_v52 = vmax.f32 %v734_v49, 0.0 }
  0xed   : > { %v735_v50 = vpop.f32.mrf.mxu0 }
  0xee   : > { %v736_v51 = vadd.f32 %v3856_v34, %v735_v50 }
  0xf0   : > { %v768_v53 = vmax.f32 %v736_v51, 0.0 }
  0xf2   : > { %v781_v54 = vpack.c.bf16 %v768_v53, %v767_v52 }
  0xf4   : > { %2512 = vmatmul.msk.bf16.gmra.mxu1 %vm823_vm3, %v781_v54 }
  0xf5   : > { %v738_v55 = vpop.f32.mrf.mxu0 }
  0xf6   : > { %v739_v56 = vadd.f32 %v3856_v34, %v738_v55 }
  0xf8   : > { %v769_v59 = vmax.f32 %v739_v56, 0.0 }
  0xfd   : > { %v740_v57 = vpop.f32.mrf.mxu0 }
  0xfe   : > { %v741_v58 = vadd.f32 %v3856_v34, %v740_v57 }
 0x100   : > { %v770_v60 = vmax.f32 %v741_v58, 0.0 }
 0x102   : > { %v782_v61 = vpack.c.bf16 %v770_v60, %v769_v59 }
 0x104   : > { %2513 = vmatmul.msk.bf16.gmra.mxu1 %vm823_vm3, %v782_v61 }
 0x105   : > { %v743_v62 = vpop.f32.mrf.mxu0 }
 0x106   : > { %v744_v63 = vadd.f32 %v3856_v34, %v743_v62 }
 0x108   : > { %v771_v2 = vmax.f32 %v744_v63, 0.0 }
 0x10d   : > { %v745_v0 = vpop.f32.mrf.mxu0 }
 0x10e   : > { %v746_v1 = vadd.f32 %v3856_v34, %v745_v0 }
 0x110   : > { %v772_v3 = vmax.f32 %v746_v1, 0.0 }
 0x112   : > { %v783_v4 = vpack.c.bf16 %v772_v3, %v771_v2 }
 0x114   : > { %2514 = vmatmul.msk.bf16.gmra.mxu1 %vm823_vm3, %v783_v4 }
 0x115   : > { %v748_v5 = vpop.f32.mrf.mxu0 }
 0x116   : > { %v749_v6 = vadd.f32 %v3856_v34, %v748_v5 }
 0x118   : > { %v773_v9 = vmax.f32 %v749_v6, 0.0 }
 0x11d   : > { %v750_v7 = vpop.f32.mrf.mxu0 }
 0x11e   : > { %v751_v8 = vadd.f32 %v3856_v34, %v750_v7 }
 0x120   : > { %v774_v10 = vmax.f32 %v751_v8, 0.0 }
 0x122   : > { %v784_v11 = vpack.c.bf16 %v774_v10, %v773_v9 }
 0x124   : > { %2515 = vmatmul.msk.bf16.gmra.mxu1 %vm823_vm3, %v784_v11 }
 0x125   : > { %v753_v12 = vpop.f32.mrf.mxu0 }
 0x126   : > { %v754_v13 = vadd.f32 %v3856_v34, %v753_v12 }
 0x128   : > { %v775_v17 = vmax.f32 %v754_v13, 0.0 }
 0x12d   : > { %v755_v14 = vpop.f32.mrf.mxu0 }
 0x12e   : > { %v756_v15 = vadd.f32 %v3856_v34, %v755_v14 }
 0x130   : > { %v776_v18 = vmax.f32 %v756_v15, 0.0 }
 0x132   : > { %v785_v19 = vpack.c.bf16 %v776_v18, %v775_v17  ;;  %v3059_v17 = vld [vmem:[%s4301_s7 + $0x10] sm:$0xff] }
 0x133   : > { %1119 = vmatpush.bf16.msra.mxu3 %v3059_v17 }
 0x134   : > { %2516 = vmatmul.msk.bf16.gmra.mxu1 %vm823_vm3, %v785_v19  ;;  %v3058_v19 = vld [vmem:[%s4301_s7 + $0x8] sm:$0xff] }
 0x135   : > { %v758_v21 = vpop.f32.mrf.mxu0 }
 0x136   : > { %v759_v24 = vadd.f32 %v3856_v34, %v758_v21 }
 0x137   : > { %1120 = vmatpush.bf16.msra.mxu3 %v3058_v19 }
 0x138   : > { %v777_v27 = vmax.f32 %v759_v24, 0.0 }
 0x13b   : > { %1121 = vmatpush.bf16.msra.mxu3 %v3057_v20  ;;  %v3061_v20 = vld [vmem:[%s4303_s9] sm:$0xff] }
 0x13d   : > { %v760_v25 = vpop.f32.mrf.mxu0 }
 0x13e   : > { %v761_v26 = vadd.f32 %v3856_v34, %v760_v25 }
 0x140   : > { %v778_v28 = vmax.f32 %v761_v26, 0.0 }
 0x142   : > { %v786_v29 = vpack.c.bf16 %v778_v28, %v777_v27  ;;  %v3935_v28 = vld [vmem:[#allocation7] ss:$0 sm:$0xff] }
 0x144   : > { %2517 = vmatmul.msk.bf16.vlgmr.msra.gmra.mxu2 %vm823_vm3, %v786_v29  ;;  %v3068_v29 = vld [vmem:[%s4303_s9 + $0x38] sm:$0xff] }
 0x145   : > { %1255 = vmatpush.bf16.msrb.mxu0 %v3068_v29 }
 0x151   : > { %v857_v30 = vpop.f32.mrf.mxu1 }
 0x152   : > { %v858_v32 = vadd.f32 %v3897_v31, %v857_v30 }
 0x154   : > { %v897_v36 = vmax.f32 %v858_v32, 0.0 }
 0x159   : > { %v859_v33 = vpop.f32.mrf.mxu1 }
 0x15a   : > { %v860_v35 = vadd.f32 %v3897_v31, %v859_v33 }
 0x15c   : > { %v898_v37 = vmax.f32 %v860_v35, 0.0 }
 0x15e   : > { %v913_v38 = vpack.c.bf16 %v898_v37, %v897_v36 }
 0x160   : > { %2534 = vmatmul.msk.bf16.vlgmr.msrb.gmra.mxu2 %vm823_vm3, %v913_v38  ;;  %v3067_v38 = vld [vmem:[%s4303_s9 + $0x30] sm:$0xff] }
 0x161   : > { %v862_v34 = vpop.f32.mrf.mxu1  ;;  %1256 = vmatpush.bf16.msrb.mxu0 %v3067_v38 }
 0x162   : > { %v863_v39 = vadd.f32 %v3897_v31, %v862_v34 }
 0x164   : > { %v899_v42 = vmax.f32 %v863_v39, 0.0 }
 0x169   : > { %v864_v40 = vpop.f32.mrf.mxu1 }
 0x16a   : > { %v865_v41 = vadd.f32 %v3897_v31, %v864_v40 }
 0x16c   : > { %v900_v43 = vmax.f32 %v865_v41, 0.0 }
 0x16e   : > { %v914_v44 = vpack.c.bf16 %v900_v43, %v899_v42 }
 0x170   : > { %2535 = vmatmul.msk.bf16.gmra.mxu2 %vm823_vm3, %v914_v44 }
 0x171   : > { %v867_v45 = vpop.f32.mrf.mxu1 }
 0x172   : > { %v868_v46 = vadd.f32 %v3897_v31, %v867_v45  ;;  %v3066_v45 = vld [vmem:[%s4303_s9 + $0x28] sm:$0xff] }
 0x173   : > { %1257 = vmatpush.bf16.msrb.mxu0 %v3066_v45 }
 0x174   : > { %v901_v49 = vmax.f32 %v868_v46, 0.0 }
 0x179   : > { %v869_v47 = vpop.f32.mrf.mxu1 }
 0x17a   : > { %v870_v48 = vadd.f32 %v3897_v31, %v869_v47 }
 0x17c   : > { %v902_v50 = vmax.f32 %v870_v48, 0.0 }
 0x17e   : > { %v915_v51 = vpack.c.bf16 %v902_v50, %v901_v49 }
 0x180   : > { %2536 = vmatmul.msk.bf16.gmra.mxu2 %vm823_vm3, %v915_v51 }
 0x181   : > { %v872_v52 = vpop.f32.mrf.mxu1 }
 0x182   : > { %v873_v53 = vadd.f32 %v3897_v31, %v872_v52 }
 0x184   : > { %v903_v56 = vmax.f32 %v873_v53, 0.0  ;;  %v3065_v53 = vld [vmem:[%s4303_s9 + $0x20] sm:$0xff] }
 0x185   : > { %1258 = vmatpush.bf16.msrb.mxu0 %v3065_v53 }
 0x189   : > { %v874_v54 = vpop.f32.mrf.mxu1 }
 0x18a   : > { %v875_v55 = vadd.f32 %v3897_v31, %v874_v54 }
 0x18c   : > { %v904_v57 = vmax.f32 %v875_v55, 0.0 }
 0x18e   : > { %v916_v58 = vpack.c.bf16 %v904_v57, %v903_v56 }
 0x190   : > { %2537 = vmatmul.msk.bf16.gmra.mxu2 %vm823_vm3, %v916_v58 }
 0x191   : > { %v877_v59 = vpop.f32.mrf.mxu1 }
 0x192   : > { %v878_v60 = vadd.f32 %v3897_v31, %v877_v59 }
 0x194   : > { %v905_v63 = vmax.f32 %v878_v60, 0.0 }
 0x199   : > { %v879_v61 = vpop.f32.mrf.mxu1 }
 0x19a   : > { %v880_v62 = vadd.f32 %v3897_v31, %v879_v61  ;;  %v3064_v61 = vld [vmem:[%s4303_s9 + $0x18] sm:$0xff] }
 0x19b   : > { %1259 = vmatpush.bf16.msrb.mxu0 %v3064_v61 }
 0x19c   : > { %v906_v0 = vmax.f32 %v880_v62, 0.0 }
 0x19e   : > { %v917_v1 = vpack.c.bf16 %v906_v0, %v905_v63 }
 0x1a0   : > { %2538 = vmatmul.msk.bf16.gmra.mxu2 %vm823_vm3, %v917_v1 }
 0x1a1   : > { %v882_v2 = vpop.f32.mrf.mxu1 }
 0x1a2   : > { %v883_v3 = vadd.f32 %v3897_v31, %v882_v2 }
 0x1a4   : > { %v907_v6 = vmax.f32 %v883_v3, 0.0 }
 0x1a9   : > { %v884_v4 = vpop.f32.mrf.mxu1 }
 0x1aa   : > { %v885_v5 = vadd.f32 %v3897_v31, %v884_v4 }
 0x1ac   : > { %v908_v7 = vmax.f32 %v885_v5, 0.0 }
 0x1ae   : > { %v918_v8 = vpack.c.bf16 %v908_v7, %v907_v6 }
 0x1b0   : > { %2539 = vmatmul.msk.bf16.gmra.mxu2 %vm823_vm3, %v918_v8  ;;  %v3063_v8 = vld [vmem:[%s4303_s9 + $0x10] sm:$0xff] }
 0x1b1   : > { %v887_v9 = vpop.f32.mrf.mxu1  ;;  %1260 = vmatpush.bf16.msrb.mxu0 %v3063_v8 }
 0x1b2   : > { %v888_v10 = vadd.f32 %v3897_v31, %v887_v9 }
 0x1b4   : > { %v909_v13 = vmax.f32 %v888_v10, 0.0 }
 0x1b9   : > { %v889_v11 = vpop.f32.mrf.mxu1 }
 0x1ba   : > { %v890_v12 = vadd.f32 %v3897_v31, %v889_v11 }
 0x1bc   : > { %v910_v14 = vmax.f32 %v890_v12, 0.0 }
 0x1be   : > { %v919_v15 = vpack.c.bf16 %v910_v14, %v909_v13  ;;  %v3062_v13 = vld [vmem:[%s4303_s9 + $0x8] sm:$0xff] }
 0x1bf   : > { %1261 = vmatpush.bf16.msrb.mxu0 %v3062_v13 }
 0x1c0   : > { %2540 = vmatmul.msk.bf16.gmra.mxu2 %vm823_vm3, %v919_v15 }
 0x1c3   : > { %1262 = vmatpush.bf16.msrb.mxu0 %v3061_v20 }
 0x1c7   : > { %v892_v18 = vpop.f32.mrf.mxu2 }
 0x1c8   : > { %v893_v21 = vadd.f32 %v3897_v31, %v892_v18 }
 0x1ca   : > { %v911_v24 = vmax.f32 %v893_v21, 0.0 }
 0x1cf   : > { %v894_v22 = vpop.f32.mrf.mxu2 }
 0x1d0   : > { %v895_v23 = vadd.f32 %v3897_v31, %v894_v22 }
 0x1d2   : > { %v912_v25 = vmax.f32 %v895_v23, 0.0 }
 0x1d4   : > { %v920_v26 = vpack.c.bf16 %v912_v25, %v911_v24 }
 0x1d6   : > { %2541 = vmatmul.msk.bf16.gmra.mxu2 %vm823_vm3, %v920_v26 }
 0x1e3   : > { %v990_v27 = vpop.f32.mrf.mxu2 }
 0x1e4   : > { %v991_v30 = vadd.f32 %v3935_v28, %v990_v27 }
 0x1e6   : > { %v1030_v35 = vmax.f32 %v991_v30, 0.0  ;;  %v3304_v30 = vld [vmem:[#allocation8] ss:$0 sm:$0xff] }
 0x1eb   : > { %v992_v32 = vpop.f32.mrf.mxu2 }
 0x1ec   : > { %v993_v33 = vadd.f32 %v3935_v28, %v992_v32 }
 0x1ee   : > { %v1031_v31 = vmax.f32 %v993_v33, 0.0 }
 0x1f0   : > { %v1046_v36 = vpack.c.bf16 %v1031_v31, %v1030_v35 }
 0x1f2   : > { %2558 = vmatmul.msk.bf16.vlgmr.msra.gmra.mxu3 %vm823_vm3, %v1046_v36 }
 0x1f3   : > { %v995_v37 = vpop.f32.mrf.mxu2 }
 0x1f4   : > { %v996_v34 = vadd.f32 %v3935_v28, %v995_v37 }
 0x1f6   : > { %v1032_v41 = vmax.f32 %v996_v34, 0.0 }
 0x1fb   : > { %v997_v39 = vpop.f32.mrf.mxu2 }
 0x1fc   : > { %v998_v40 = vadd.f32 %v3935_v28, %v997_v39 }
 0x1fe   : > { %v1033_v42 = vmax.f32 %v998_v40, 0.0 }
 0x200   : > { %v1047_v43 = vpack.c.bf16 %v1033_v42, %v1032_v41 }
 0x202   : > { %2559 = vmatmul.msk.bf16.gmra.mxu3 %vm823_vm3, %v1047_v43 }
 0x203   : > { %v1000_v44 = vpop.f32.mrf.mxu2 }
 0x204   : > { %v1001_v46 = vadd.f32 %v3935_v28, %v1000_v44 }
 0x206   : > { %v1034_v49 = vmax.f32 %v1001_v46, 0.0 }
 0x20b   : > { %v1002_v47 = vpop.f32.mrf.mxu2 }
 0x20c   : > { %v1003_v48 = vadd.f32 %v3935_v28, %v1002_v47 }
 0x20e   : > { %v1035_v50 = vmax.f32 %v1003_v48, 0.0 }
 0x210   : > { %v1048_v51 = vpack.c.bf16 %v1035_v50, %v1034_v49 }
 0x212   : > { %2560 = vmatmul.msk.bf16.gmra.mxu3 %vm823_vm3, %v1048_v51 }
 0x213   : > { %v1005_v52 = vpop.f32.mrf.mxu2 }
 0x214   : > { %v1006_v54 = vadd.f32 %v3935_v28, %v1005_v52 }
 0x216   : > { %v1036_v57 = vmax.f32 %v1006_v54, 0.0 }
 0x21b   : > { %v1007_v55 = vpop.f32.mrf.mxu2 }
 0x21c   : > { %v1008_v56 = vadd.f32 %v3935_v28, %v1007_v55 }
 0x21e   : > { %v1037_v58 = vmax.f32 %v1008_v56, 0.0 }
 0x220   : > { %v1049_v59 = vpack.c.bf16 %v1037_v58, %v1036_v57 }
 0x222   : > { %2561 = vmatmul.msk.bf16.gmra.mxu3 %vm823_vm3, %v1049_v59 }
 0x223   : > { %v1010_v60 = vpop.f32.mrf.mxu2 }
 0x224   : > { %v1011_v62 = vadd.f32 %v3935_v28, %v1010_v60 }
 0x226   : > { %v1038_v1 = vmax.f32 %v1011_v62, 0.0 }
 0x22b   : > { %v1012_v63 = vpop.f32.mrf.mxu2 }
 0x22c   : > { %v1013_v0 = vadd.f32 %v3935_v28, %v1012_v63 }
 0x22e   : > { %v1039_v2 = vmax.f32 %v1013_v0, 0.0 }
 0x230   : > { %v1050_v3 = vpack.c.bf16 %v1039_v2, %v1038_v1 }
 0x232   : > { %2562 = vmatmul.msk.bf16.gmra.mxu3 %vm823_vm3, %v1050_v3 }
 0x233   : > { %v1015_v4 = vpop.f32.mrf.mxu2 }
 0x234   : > { %v1016_v5 = vadd.f32 %v3935_v28, %v1015_v4 }
 0x236   : > { %v1040_v9 = vmax.f32 %v1016_v5, 0.0 }
 0x23b   : > { %v1017_v6 = vpop.f32.mrf.mxu2 }
 0x23c   : > { %v1018_v7 = vadd.f32 %v3935_v28, %v1017_v6 }
 0x23e   : > { %v1041_v10 = vmax.f32 %v1018_v7, 0.0 }
 0x240   : > { %v1051_v11 = vpack.c.bf16 %v1041_v10, %v1040_v9 }
 0x242   : > { %2563 = vmatmul.msk.bf16.gmra.mxu3 %vm823_vm3, %v1051_v11 }
 0x243   : > { %v1020_v12 = vpop.f32.mrf.mxu2 }
 0x244   : > { %v1021_v14 = vadd.f32 %v3935_v28, %v1020_v12 }
 0x246   : > { %v1042_v17 = vmax.f32 %v1021_v14, 0.0 }
 0x24b   : > { %v1022_v15 = vpop.f32.mrf.mxu2 }
 0x24c   : > { %v1023_v16 = vadd.f32 %v3935_v28, %v1022_v15 }
 0x24e   : > { %v1043_v18 = vmax.f32 %v1023_v16, 0.0 }
 0x250   : > { %v1052_v19 = vpack.c.bf16 %v1043_v18, %v1042_v17 }
 0x252   : > { %2564 = vmatmul.msk.bf16.gmra.mxu3 %vm823_vm3, %v1052_v19 }
 0x259   : > { %v1025_v21 = vpop.f32.mrf.mxu2 }
 0x25a   : > { %v1026_v22 = vadd.f32 %v3935_v28, %v1025_v21 }
 0x25c   : > { %v1044_v25 = vmax.f32 %v1026_v22, 0.0  ;;  %v3985_v22 = vld [vmem:[#allocation10] ss:$0 sm:$0xff] }
 0x261   : > { %v1027_v23 = vpop.f32.mrf.mxu2 }
 0x262   : > { %v1028_v24 = vadd.f32 %v3935_v28, %v1027_v23 }
 0x264   : > { %v1045_v26 = vmax.f32 %v1028_v24, 0.0 }
 0x266   : > { %v1053_v27 = vpack.c.bf16 %v1045_v26, %v1044_v25 }
 0x268   : > { %2565 = vmatmul.msk.bf16.gmra.mxu3 %vm823_vm3, %v1053_v27 }
 0x275   : > { %v1123_v29 = vpop.f32.mrf.mxu3 }
 0x276   : > { %v1124_v32 = vadd.f32 %v3304_v30, %v1123_v29 }
 0x278   : > { %v1163_v31 = vmax.f32 %v1124_v32, 0.0 }
 0x27d   : > { %v1125_v33 = vpop.f32.mrf.mxu3 }
 0x27e   : > { %v1126_v35 = vadd.f32 %v3304_v30, %v1125_v33 }
 0x280   : > { %v1164_v36 = vmax.f32 %v1126_v35, 0.0 }
 0x282   : > { %v1179_v37 = vpack.c.bf16 %v1164_v36, %v1163_v31 }
 0x284   : > { %1263 = vmatmul.bf16.vlgmr.msrb.gmra.mxu0 %v1179_v37 }
 0x285   : > { %v1128_v38 = vpop.f32.mrf.mxu3 }
 0x286   : > { %v1129_v34 = vadd.f32 %v3304_v30, %v1128_v38 }
 0x288   : > { %v1165_v41 = vmax.f32 %v1129_v34, 0.0 }
 0x28d   : > { %v1130_v39 = vpop.f32.mrf.mxu3 }
 0x28e   : > { %v1131_v40 = vadd.f32 %v3304_v30, %v1130_v39 }
 0x290   : > { %v1166_v28 = vmax.f32 %v1131_v40, 0.0 }
 0x292   : > { %v1180_v42 = vpack.c.bf16 %v1166_v28, %v1165_v41 }
 0x294   : > { %1268 = vmatmul.bf16.gmra.mxu0 %v1180_v42 }
 0x295   : > { %v1133_v43 = vpop.f32.mrf.mxu3 }
 0x296   : > { %v1134_v44 = vadd.f32 %v3304_v30, %v1133_v43 }
 0x298   : > { %v1167_v47 = vmax.f32 %v1134_v44, 0.0 }
 0x29d   : > { %v1135_v45 = vpop.f32.mrf.mxu3 }
 0x29e   : > { %v1136_v46 = vadd.f32 %v3304_v30, %v1135_v45 }
 0x2a0   : > { %v1168_v48 = vmax.f32 %v1136_v46, 0.0 }
 0x2a2   : > { %v1181_v49 = vpack.c.bf16 %v1168_v48, %v1167_v47 }
 0x2a4   : > { %1273 = vmatmul.bf16.gmra.mxu0 %v1181_v49 }
 0x2a5   : > { %v1138_v50 = vpop.f32.mrf.mxu3 }
 0x2a6   : > { %v1139_v51 = vadd.f32 %v3304_v30, %v1138_v50 }
 0x2a8   : > { %v1169_v54 = vmax.f32 %v1139_v51, 0.0 }
 0x2ad   : > { %v1140_v52 = vpop.f32.mrf.mxu3 }
 0x2ae   : > { %v1141_v53 = vadd.f32 %v3304_v30, %v1140_v52 }
 0x2b0   : > { %v1170_v55 = vmax.f32 %v1141_v53, 0.0 }
 0x2b2   : > { %v1182_v56 = vpack.c.bf16 %v1170_v55, %v1169_v54 }
 0x2b4   : > { %1278 = vmatmul.bf16.gmra.mxu0 %v1182_v56 }
 0x2b5   : > { %v1143_v57 = vpop.f32.mrf.mxu3 }
 0x2b6   : > { %v1144_v58 = vadd.f32 %v3304_v30, %v1143_v57 }
 0x2b8   : > { %v1171_v61 = vmax.f32 %v1144_v58, 0.0 }
 0x2bd   : > { %v1145_v59 = vpop.f32.mrf.mxu3 }
 0x2be   : > { %v1146_v60 = vadd.f32 %v3304_v30, %v1145_v59 }
 0x2c0   : > { %v1172_v62 = vmax.f32 %v1146_v60, 0.0 }
 0x2c2   : > { %v1183_v63 = vpack.c.bf16 %v1172_v62, %v1171_v61 }
 0x2c4   : > { %1283 = vmatmul.bf16.gmra.mxu0 %v1183_v63 }
 0x2c5   : > { %v1148_v0 = vpop.f32.mrf.mxu3 }
 0x2c6   : > { %v1149_v1 = vadd.f32 %v3304_v30, %v1148_v0 }
 0x2c8   : > { %v1173_v4 = vmax.f32 %v1149_v1, 0.0 }
 0x2cd   : > { %v1150_v2 = vpop.f32.mrf.mxu3 }
 0x2ce   : > { %v1151_v3 = vadd.f32 %v3304_v30, %v1150_v2 }
 0x2d0   : > { %v1174_v5 = vmax.f32 %v1151_v3, 0.0 }
 0x2d2   : > { %v1184_v6 = vpack.c.bf16 %v1174_v5, %v1173_v4 }
 0x2d4   : > { %1288 = vmatmul.bf16.gmra.mxu0 %v1184_v6 }
 0x2d5   : > { %v1153_v7 = vpop.f32.mrf.mxu3 }
 0x2d6   : > { %v1154_v8 = vadd.f32 %v3304_v30, %v1153_v7 }
 0x2d8   : > { %v1175_v11 = vmax.f32 %v1154_v8, 0.0 }
 0x2dd   : > { %v1155_v9 = vpop.f32.mrf.mxu3 }
 0x2de   : > { %v1156_v10 = vadd.f32 %v3304_v30, %v1155_v9 }
 0x2e0   : > { %v1176_v12 = vmax.f32 %v1156_v10, 0.0 }
 0x2e2   : > { %v1185_v13 = vpack.c.bf16 %v1176_v12, %v1175_v11 }
 0x2e4   : > { %1293 = vmatmul.bf16.gmra.mxu0 %v1185_v13 }
 0x2eb   : > { %v1158_v14 = vpop.f32.mrf.mxu3 }
 0x2ec   : > { %v1159_v15 = vadd.f32 %v3304_v30, %v1158_v14 }
 0x2ee   : > { %v1177_v18 = vmax.f32 %v1159_v15, 0.0 }
 0x2f3   : > { %v1160_v16 = vpop.f32.mrf.mxu3 }
 0x2f4   : > { %v1161_v17 = vadd.f32 %v3304_v30, %v1160_v16 }
 0x2f6   : > { %v1178_v19 = vmax.f32 %v1161_v17, 0.0 }
 0x2f8   : > { %v1186_v20 = vpack.c.bf16 %v1178_v19, %v1177_v18 }
 0x2fa   : > { %1298 = vmatmul.bf16.gmra.mxu0 %v1186_v20 }
 0x301   : > { %v1264_v21 = vpop.f32.mrf.mxu0 }
 0x302   : > { %v1265_v23 = vadd.f32 %v3985_v22, %v1264_v21 }
 0x304   : > { %v1304_v25 = vmax.f32 %v1265_v23, 0.0 }
 0x306   : > { %v1357_v29 = vsel %vm823_vm3, %v1304_v25, 0.0  ;;  %v1320_v44 = vsel %vm823_vm3, %v1304_v25, -inf }
 0x309   : > { %v1266_v24 = vpop.f32.mrf.mxu0 }
 0x30a   : > { %v1267_v26 = vadd.f32 %v3985_v22, %v1266_v24 }
 0x30c   : > { %v1305_v27 = vmax.f32 %v1267_v26, 0.0 }
 0x30e   : > { %v1358_v32 = vsel %vm823_vm3, %v1305_v27, 0.0  ;;  %v1321_v52 = vsel %vm823_vm3, %v1305_v27, -inf }
 0x30f   : > { %v1359_v33 = vadd.f32 %v1358_v32, %v1357_v29 }
 0x311   : > { %v1269_v30 = vpop.f32.mrf.mxu0 }
 0x312   : > { %v1270_v35 = vadd.f32 %v3985_v22, %v1269_v30 }
 0x314   : > { %v1306_v31 = vmax.f32 %v1270_v35, 0.0 }
 0x316   : > { %v1360_v36 = vsel %vm823_vm3, %v1306_v31, 0.0  ;;  %v1322_v58 = vsel %vm823_vm3, %v1306_v31, -inf  ;;  %v3097_v31 = vld [vmem:[%s4305_s11 + $0xe4] sm:$0xf] }
 0x317   : > { %v1361_v37 = vadd.f32 %v1360_v36, %v1359_v33  ;;  %v2714_v36 = vld [vmem:[%s4305_s11 + $0xf0] sm:$0xf0] }
 0x319   : > { %v1271_v38 = vpop.f32.mrf.mxu0 }
 0x31a   : > { %v1272_v34 = vadd.f32 %v3985_v22, %v1271_v38 }
 0x31c   : > { %v1307_v39 = vmax.f32 %v1272_v34, 0.0  ;;  %v2717_v34 = vor.u32 %v3097_v31, %v2714_v36 }
 0x31e   : > { %v1362_v40 = vsel %vm823_vm3, %v1307_v39, 0.0  ;;  %v1323_v0 = vsel %vm823_vm3, %v1307_v39, -inf  ;;  %1616 = vmatpush.bf16.msra.mxu2 %v2717_v34 }
 0x31f   : > { %v1363_v41 = vadd.f32 %v1362_v40, %v1361_v37 }
 0x321   : > { %v1274_v28 = vpop.f32.mrf.mxu0 }
 0x322   : > { %v1275_v42 = vadd.f32 %v3985_v22, %v1274_v28 }
 0x324   : > { %v1308_v43 = vmax.f32 %v1275_v42, 0.0 }
 0x326   : > { %v1324_v45 = vsel %vm823_vm3, %v1308_v43, -inf  ;;  %v1364_v46 = vsel %vm823_vm3, %v1308_v43, 0.0 }
 0x327   : > { %v1325_v47 = vmax.f32 %v1320_v44, %v1324_v45  ;;  %v1365_v48 = vadd.f32 %v1364_v46, %v1363_v41 }
 0x329   : > { %v1276_v49 = vpop.f32.mrf.mxu0 }
 0x32a   : > { %v1277_v50 = vadd.f32 %v3985_v22, %v1276_v49 }
 0x32c   : > { %v1309_v51 = vmax.f32 %v1277_v50, 0.0  ;;  %v2698_v50 = vld [vmem:[%s4305_s11 + $0xd0] sm:$0xf0] }
 0x32e   : > { %v1326_v53 = vsel %vm823_vm3, %v1309_v51, -inf  ;;  %v1366_v30 = vsel %vm823_vm3, %v1309_v51, 0.0  ;;  %v2720_v51 = vld [vmem:[%s4305_s11 + $0xe8] sm:$0xf] }
 0x32f   : > { %v1327_v54 = vmax.f32 %v1321_v52, %v1326_v53  ;;  %v1367_v39 = vadd.f32 %v1366_v30, %v1365_v48  ;;  %v3093_v48 = vld [vmem:[%s4305_s11 + $0xc4] sm:$0xf]  ;;  %v3100_v53 = vld [vmem:[%s4305_s11 + $0xf4] sm:$0xf0] }
 0x330   : > { %v2701_v52 = vor.u32 %v3093_v48, %v2698_v50  ;;  %v2632_v50 = vld [vmem:[%s4305_s11 + $0x40] sm:$0xf] }
 0x331   : > { %v1279_v55 = vpop.f32.mrf.mxu0 }
 0x332   : > { %v1280_v56 = vadd.f32 %v3985_v22, %v1279_v55  ;;  %v3099_v55 = vld [vmem:[%s4305_s11 + $0xec] sm:$0xf0]  ;;  %1617 = vmatpush.bf16.msra.mxu2 %v2701_v52 }
 0x334   : > { %v1310_v57 = vmax.f32 %v1280_v56, 0.0 }
 0x336   : > { %v1328_v59 = vsel %vm823_vm3, %v1310_v57, -inf  ;;  %v1368_v37 = vsel %vm823_vm3, %v1310_v57, 0.0 }
 0x337   : > { %v1329_v60 = vmax.f32 %v1322_v58, %v1328_v59  ;;  %v1369_v28 = vadd.f32 %v1368_v37, %v1367_v39  ;;  %v2721_v58 = vor.u32 %v3100_v53, %v2720_v51  ;;  %v2648_v37 = vld [vmem:[%s4305_s11 + $0x60] sm:$0xf] }
 0x339   : > { %v1281_v61 = vpop.f32.mrf.mxu0  ;;  %1629 = vmatpush.bf16.msrb.mxu3 %v2721_v58 }
 0x33a   : > { %v1282_v62 = vadd.f32 %v3985_v22, %v1281_v61  ;;  %v2682_v61 = vld [vmem:[%s4305_s11 + $0xb0] sm:$0xf0] }
 0x33c   : > { %v1311_v63 = vmax.f32 %v1282_v62, 0.0  ;;  %v2696_v62 = vld [vmem:[%s4305_s11 + $0xc0] sm:$0xf] }
 0x33e   : > { %v1330_v1 = vsel %vm823_vm3, %v1311_v63, -inf  ;;  %v1370_v41 = vsel %vm823_vm3, %v1311_v63, 0.0 }
 0x33f   : > { %v1331_v2 = vmax.f32 %v1323_v0, %v1330_v1  ;;  %v1371_v44 = vadd.f32 %v1370_v41, %v1369_v28  ;;  %v3095_v1 = vld [vmem:[%s4305_s11 + $0xcc] sm:$0xf0]  ;;  %v3077_v41 = vld [vmem:[%s4305_s11 + $0x44] sm:$0xf] }
 0x341   : > { %v1284_v3 = vpop.f32.mrf.mxu0 }
 0x342   : > { %v1285_v4 = vadd.f32 %v3985_v22, %v1284_v3  ;;  %v3096_v3 = vld [vmem:[%s4305_s11 + $0xd4] sm:$0xf0] }
 0x344   : > { %v1312_v5 = vmax.f32 %v1285_v4, 0.0 }
 0x346   : > { %v1332_v6 = vsel %vm823_vm3, %v1312_v5, -inf  ;;  %v1372_v43 = vsel %vm823_vm3, %v1312_v5, 0.0  ;;  %v2697_v5 = vor.u32 %v3095_v1, %v2696_v62  ;;  %v2616_v1 = vld [vmem:[%s4305_s11 + $0x20] sm:$0xf] }
 0x347   : > { %v1333_v7 = vmax.f32 %v1325_v47, %v1332_v6  ;;  %v1373_v49 = vadd.f32 %v1372_v43, %v1371_v44  ;;  %v2656_v43 = vld [vmem:[%s4305_s11 + $0x68] sm:$0xf]  ;;  %v3084_v44 = vld [vmem:[%s4305_s11 + $0x74] sm:$0xf0] }
 0x348   : > { %v2657_v53 = vor.u32 %v3084_v44, %v2656_v43  ;;  %v3070_v44 = vld [vmem:[%s4305_s11 + $0xc] sm:$0xf] }
 0x349   : > { %v1286_v8 = vpop.f32.mrf.mxu0 }
 0x34a   : > { %v1287_v9 = vadd.f32 %v3985_v22, %v1286_v8  ;;  %v3091_v8 = vld [vmem:[%s4305_s11 + $0xac] sm:$0xf0] }
 0x34c   : > { %v1313_v10 = vmax.f32 %v1287_v9, 0.0  ;;  %v3085_v9 = vld [vmem:[%s4305_s11 + $0x84] sm:$0xf] }
 0x34e   : > { %v1334_v11 = vsel %vm823_vm3, %v1313_v10, -inf  ;;  %v1374_v45 = vsel %vm823_vm3, %v1313_v10, 0.0 }
 0x34f   : > { %v1335_v12 = vmax.f32 %v1327_v54, %v1334_v11  ;;  %v2712_v54 = vld [vmem:[%s4305_s11 + $0xe0] sm:$0xf]  ;;  %v1375_v56 = vadd.f32 %v1374_v45, %v1373_v49  ;;  %v2666_v11 = vld [vmem:[%s4305_s11 + $0x90] sm:$0xf0] }
 0x350   : > { %v2713_v59 = vor.u32 %v3099_v55, %v2712_v54  ;;  %v3079_v54 = vld [vmem:[%s4305_s11 + $0x4c] sm:$0xf0]  ;;  %v3073_v55 = vld [vmem:[%s4305_s11 + $0x24] sm:$0xf] }
 0x351   : > { %v1289_v13 = vpop.f32.mrf.mxu0 }
 0x352   : > { %v1290_v14 = vadd.f32 %v3985_v22, %v1289_v13  ;;  %1603 = vmatpush.bf16.msrb.mxu1 %v2713_v59 }
 0x354   : > { %v1314_v15 = vmax.f32 %v1290_v14, 0.0  ;;  %v3092_v14 = vld [vmem:[%s4305_s11 + $0xb4] sm:$0xf0] }
 0x356   : > { %v1336_v16 = vsel %vm823_vm3, %v1314_v15, -inf  ;;  %v1376_v46 = vsel %vm823_vm3, %v1314_v15, 0.0  ;;  %1604 = vmatpush.bf16.msrb.mxu1 %v2697_v5  ;;  %v3076_v5 = vld [vmem:[%s4305_s11 + $0x34] sm:$0xf0] }
 0x357   : > { %v4014_v17 = vmax.f32 %v1329_v60, %v1336_v16  ;;  %v3089_v60 = vld [vmem:[%s4305_s11 + $0xa4] sm:$0xf]  ;;  %v1377_v4 = vadd.f32 %v1376_v46, %v1375_v56  ;;  %v2618_v56 = vld [vmem:[%s4305_s11 + $0x30] sm:$0xf0] }
 0x358   : > { %v2685_v0 = vor.u32 %v3089_v60, %v2682_v61  ;;  %v2633_v60 = vor.u32 %v3079_v54, %v2632_v50  ;;  %v2621_v61 = vor.u32 %v3073_v55, %v2618_v56  ;;  %v3116_v50 = vld [vmem:[#allocation11 + $0x74] sm:$0xf0]  ;;  %v2848_v54 = vld [vmem:[#allocation11 + $0xf0] sm:$0xf] }
 0x359   : > { %v1291_v18 = vpop.f32.mrf.mxu0  ;;  %v3132_v55 = vld [vmem:[#allocation11 + $0xf4] sm:$0xf0] }
 0x35a   : > { %v1292_v19 = vadd.f32 %v3985_v22, %v1291_v18  ;;  %1618 = vmatpush.bf16.msra.mxu2 %v2685_v0  ;;  %v2849_v56 = vor.u32 %v3132_v55, %v2848_v54  ;;  %v3115_v55 = vld [vmem:[#allocation11 + $0x74] sm:$0xf] }
 0x35c   : > { %v1315_v20 = vmax.f32 %v1292_v19, 0.0  ;;  %v2669_v19 = vor.u32 %v3085_v9, %v2666_v11  ;;  %v2600_v11 = vld [vmem:[%s4305_s11] sm:$0xf] }
 0x35e   : > { %v1338_v21 = vsel %vm823_vm3, %v1315_v20, -inf  ;;  %v1378_v47 = vsel %vm823_vm3, %v1315_v20, 0.0  ;;  %1619 = vmatpush.bf16.msra.mxu2 %v2669_v19 }
 0x35f   : > { %v4018_v23 = vmax.f32 %v1331_v2, %v1338_v21  ;;  %v2704_v2 = vld [vmem:[%s4305_s11 + $0xc8] sm:$0xf]  ;;  %v1379_v13 = vadd.f32 %v1378_v47, %v1377_v4 }
 0x360   : > { %v2705_v6 = vor.u32 %v3096_v3, %v2704_v2  ;;  %v3069_v2 = vld [vmem:[%s4305_s11 + $0x4] sm:$0xf]  ;;  %v2602_v3 = vld [vmem:[%s4305_s11 + $0x10] sm:$0xf0]  ;;  %v2624_v4 = vld [vmem:[%s4305_s11 + $0x28] sm:$0xf] }
 0x361   : > { %v1294_v24 = vpop.f32.mrf.mxu0 }
 0x362   : > { %v1295_v25 = vadd.f32 %v3985_v22, %v1294_v24  ;;  %1630 = vmatpush.bf16.msrb.mxu3 %v2705_v6 }
 0x364   : > { %v1316_v26 = vmax.f32 %v1295_v25, 0.0  ;;  %v2664_v25 = vld [vmem:[%s4305_s11 + $0x80] sm:$0xf] }
 0x366   : > { %v1340_v27 = vsel %vm823_vm3, %v1316_v26, -inf  ;;  %v1380_v15 = vsel %vm823_vm3, %v1316_v26, 0.0  ;;  %v3081_v26 = vld [vmem:[%s4305_s11 + $0x64] sm:$0xf] }
 0x367   : > { %v1341_v29 = vmax.f32 %v1333_v7, %v1340_v27  ;;  %v2680_v7 = vld [vmem:[%s4305_s11 + $0xa0] sm:$0xf]  ;;  %v2650_v27 = vld [vmem:[%s4305_s11 + $0x70] sm:$0xf0] }
 0x368   : > { %v2681_v21 = vor.u32 %v3091_v8, %v2680_v7  ;;  %v2653_v36 = vor.u32 %v3081_v26, %v2650_v27  ;;  %v2605_v7 = vor.u32 %v3069_v2, %v2602_v3  ;;  %v3090_v26 = vld [vmem:[%s4305_s11 + $0xac] sm:$0xf]  ;;  %v2690_v27 = vld [vmem:[%s4305_s11 + $0xb8] sm:$0xf0] }
 0x369   : > { %v1296_v32 = vpop.f32.mrf.mxu0  ;;  %v2760_v3 = vld [vmem:[#allocation11 + $0x40] sm:$0xf] }
 0x36a   : > { %v1297_v33 = vadd.f32 %v3985_v22, %v1296_v32  ;;  %v3088_v32 = vld [vmem:[%s4305_s11 + $0x94] sm:$0xf0]  ;;  %1605 = vmatpush.bf16.msrb.mxu1 %v2681_v21  ;;  %1620 = vmatpush.bf16.msra.mxu2 %v2653_v36  ;;  %v3094_v21 = vld [vmem:[%s4305_s11 + $0xcc] sm:$0xf] }
 0x36b   : > { %v3082_v36 = vld [vmem:[%s4305_s11 + $0x6c] sm:$0xf] }
 0x36c   : > { %v1317_v35 = vmax.f32 %v1297_v33, 0.0  ;;  %v1381_v33 = vadd.f32 %v1380_v15, %v1379_v13  ;;  %v2722_v15 = vld [vmem:[%s4305_s11 + $0xf8] sm:$0xf0] }
 0x36e   : > { %v1342_v38 = vsel %vm823_vm3, %v1317_v35, -inf  ;;  %v1382_v16 = vsel %vm823_vm3, %v1317_v35, 0.0 }
 0x36f   : > { %v1343_v40 = vmax.f32 %v1335_v12, %v1342_v38  ;;  %v2688_v12 = vld [vmem:[%s4305_s11 + $0xa8] sm:$0xf]  ;;  %v1383_v38 = vadd.f32 %v1382_v16, %v1381_v33  ;;  %v3086_v33 = vld [vmem:[%s4305_s11 + $0x8c] sm:$0xf] }
 0x370   : > { %v2689_v24 = vor.u32 %v3092_v14, %v2688_v12  ;;  %v3071_v12 = vld [vmem:[%s4305_s11 + $0xc] sm:$0xf0]  ;;  %v3098_v14 = vld [vmem:[%s4305_s11 + $0xec] sm:$0xf] }
 0x371   : > { %v4033_v42 = vmax.f32 %v1341_v29, %v1343_v40  ;;  %v2672_v29 = vld [vmem:[%s4305_s11 + $0x88] sm:$0xf]  ;;  %v3083_v40 = vld [vmem:[%s4305_s11 + $0x6c] sm:$0xf0]  ;;  %v2725_v19 = vor.u32 %v3098_v14, %v2722_v15 }
 0x372   : > { %1631 = vmatpush.bf16.msrb.mxu3 %v2689_v24  ;;  %v2673_v39 = vor.u32 %v3088_v32, %v2672_v29  ;;  %v2649_v49 = vor.u32 %v3083_v40, %v2648_v37  ;;  %v2706_v24 = vld [vmem:[%s4305_s11 + $0xd8] sm:$0xf0]  ;;  %v2608_v29 = vld [vmem:[%s4305_s11 + $0x8] sm:$0xf]  ;;  %v3072_v32 = vld [vmem:[%s4305_s11 + $0x14] sm:$0xf0] }
 0x373   : > { %v2658_v37 = vld [vmem:[%s4305_s11 + $0x78] sm:$0xf0] }
 0x376   : > { %1632 = vmatpush.bf16.msrb.mxu3 %v2673_v39  ;;  %v2642_v39 = vld [vmem:[%s4305_s11 + $0x58] sm:$0xf0] }
 0x377   : > { %v1299_v57 = vpop.f32.mrf.mxu0 }
 0x378   : > { %v1300_v63 = vadd.f32 %v3985_v22, %v1299_v57  ;;  %v3080_v57 = vld [vmem:[%s4305_s11 + $0x54] sm:$0xf0] }
 0x37a   : > { %v1318_v10 = vmax.f32 %v1300_v63, 0.0  ;;  %1633 = vmatpush.bf16.msrb.mxu3 %v2657_v53  ;;  %v3114_v53 = vld [vmem:[#allocation11 + $0x64] sm:$0xf0] }
 0x37c   : > { %v1344_v18 = vsel %vm823_vm3, %v1318_v10, -inf  ;;  %v1384_v35 = vsel %vm823_vm3, %v1318_v10, 0.0  ;;  %v2625_v10 = vor.u32 %v3076_v5, %v2624_v4  ;;  %v2912_v5 = vld [vmem:[#allocation11 + $0x170] sm:$0xf] }
 0x37d   : > { %v1345_v20 = vmax.f32 %v4014_v17, %v1344_v18  ;;  %v3087_v17 = vld [vmem:[%s4305_s11 + $0x8c] sm:$0xf0]  ;;  %v1385_v45 = vadd.f32 %v1384_v35, %v1383_v38  ;;  %v2601_v18 = vor.u32 %v3071_v12, %v2600_v11  ;;  %v2674_v35 = vld [vmem:[%s4305_s11 + $0x98] sm:$0xf0]  ;;  %v2661_v38 = vor.u32 %v3082_v36, %v2658_v37  ;;  %v3104_v37 = vld [vmem:[#allocation11 + $0x14] sm:$0xf0] }
 0x37e   : > { %v2665_v34 = vor.u32 %v3087_v17, %v2664_v25  ;;  %v2709_v25 = vor.u32 %v3094_v21, %v2706_v24  ;;  %v2693_v17 = vor.u32 %v3090_v26, %v2690_v27  ;;  %v2752_v12 = vld [vmem:[#allocation11 + $0x30] sm:$0xf]  ;;  %v2744_v26 = vld [vmem:[#allocation11 + $0x20] sm:$0xf]  ;;  %v3106_v27 = vld [vmem:[#allocation11 + $0x24] sm:$0xf0] }
 0x37f   : > { %v1301_v30 = vpop.f32.mrf.mxu0  ;;  %v2816_v24 = vld [vmem:[#allocation11 + $0xb0] sm:$0xf] }
 0x380   : > { %v1302_v31 = vadd.f32 %v3985_v22, %v1301_v30  ;;  %v2634_v22 = vld [vmem:[%s4305_s11 + $0x50] sm:$0xf0]  ;;  %1606 = vmatpush.bf16.msrb.mxu1 %v2665_v34  ;;  %v2609_v30 = vor.u32 %v3072_v32, %v2608_v29  ;;  %v3078_v34 = vld [vmem:[%s4305_s11 + $0x4c] sm:$0xf]  ;;  %v2896_v32 = vld [vmem:[#allocation11 + $0x150] sm:$0xf] }
 0x381   : > { %v2637_v48 = vor.u32 %v3077_v41, %v2634_v22  ;;  %v2645_v40 = vor.u32 %v3078_v34, %v2642_v39  ;;  %v3074_v41 = vld [vmem:[%s4305_s11 + $0x2c] sm:$0xf]  ;;  %v2626_v22 = vld [vmem:[%s4305_s11 + $0x38] sm:$0xf0] }
 0x382   : > { %v1319_v28 = vmax.f32 %v1302_v31, 0.0  ;;  %v2677_v31 = vor.u32 %v3086_v33, %v2674_v35  ;;  %v3144_v33 = vld [vmem:[#allocation11 + $0x154] sm:$0xf0]  ;;  %v2808_v35 = vld [vmem:[#allocation11 + $0xa0] sm:$0xf] }
 0x383   : > { %1621 = vmatpush.bf16.msra.mxu2 %v2637_v48  ;;  %v2784_v48 = vld [vmem:[#allocation11 + $0x70] sm:$0xf]  ;;  %v2888_v39 = vld [vmem:[#allocation11 + $0x140] sm:$0xf] }
 0x384   : > { %v1346_v46 = vsel %vm823_vm3, %v1319_v28, -inf  ;;  %v1386_v47 = vsel %vm823_vm3, %v1319_v28, 0.0  ;;  %1607 = vmatpush.bf16.msrb.mxu1 %v2649_v49  ;;  %v2629_v28 = vor.u32 %v3074_v41, %v2626_v22  ;;  %v2736_v36 = vld [vmem:[#allocation11 + $0x10] sm:$0xf] }
 0x385   : > { %v1347_v51 = vmax.f32 %v4018_v23, %v1346_v46  ;;  %v1387_v52 = vadd.f32 %v1386_v47, %v1385_v45  ;;  %v2640_v23 = vld [vmem:[%s4305_s11 + $0x48] sm:$0xf]  ;;  %v2610_v45 = vld [vmem:[%s4305_s11 + $0x18] sm:$0xf0]  ;;  %v2737_v41 = vor.u32 %v3104_v37, %v2736_v36  ;;  %v3129_v37 = vld [vmem:[#allocation11 + $0xe4] sm:$0xf] }
 0x386   : > { %v2641_v0 = vor.u32 %v3080_v57, %v2640_v23  ;;  %v2613_v46 = vor.u32 %v3070_v44, %v2610_v45  ;;  %v2840_v23 = vld [vmem:[#allocation11 + $0xe0] sm:$0xf]  ;;  %v2800_v22 = vld [vmem:[#allocation11 + $0x90] sm:$0xf]  ;;  %v3102_v44 = vld [vmem:[#allocation11 + $0x4] sm:$0xf0] }
 0x387   : > { %v1349_v58 = vmax.f32 %v1345_v20, %v1347_v51  ;;  %v1388_v59 = vrot.slane %v1387_v52, 4  ;;  %1622 = vmatpush.bf16.msra.mxu2 %v2621_v61  ;;  %v2776_v51 = vld [vmem:[#allocation11 + $0x60] sm:$0xf]  ;;  %v3112_v61 = vld [vmem:[#allocation11 + $0x54] sm:$0xf0] }
 0x388   : > { %1608 = vmatpush.bf16.msrb.mxu1 %v2633_v60  ;;  %1634 = vmatpush.bf16.msrb.mxu3 %v2641_v0  ;;  %v2768_v60 = vld [vmem:[#allocation11 + $0x50] sm:$0xf]  ;;  %v3128_v0 = vld [vmem:[#allocation11 + $0xd4] sm:$0xf0] }
 0x389   : > { %v4158_v62 = vmax.f32 %v4033_v42, %v1349_v58  ;;  %v1389_v63 = vadd.f32 %v1388_v59, %v1387_v52  ;;  %v3075_v42 = vld [vmem:[%s4305_s11 + $0x2c] sm:$0xf0]  ;;  %v2785_v52 = vor.u32 %v3116_v50, %v2784_v48  ;;  %v2777_v58 = vor.u32 %v3114_v53, %v2776_v51  ;;  %v2976_v45 = vld [vmem:[#allocation11 + $0x1f0] sm:$0xf]  ;;  %v3140_v50 = vld [vmem:[#allocation11 + $0x134] sm:$0xf0] }
 0x38a   : > { %v2617_v9 = vor.u32 %v3075_v42, %v2616_v1  ;;  %v3130_v59 = vld [vmem:[#allocation11 + $0xe4] sm:$0xf0]  ;;  %v2769_v2 = vor.u32 %v3112_v61, %v2768_v60  ;;  %v2880_v48 = vld [vmem:[#allocation11 + $0x130] sm:$0xf]  ;;  %v2872_v60 = vld [vmem:[#allocation11 + $0x120] sm:$0xf] }
 0x38b   : > { %v1390_v6 = vrot.slane %v1389_v63, 2  ;;  %1623 = vmatpush.bf16.msra.mxu2 %v2605_v7  ;;  %v1351_v43 = vrot.slane %v4158_v62, 4  ;;  %v3110_v42 = vld [vmem:[#allocation11 + $0x44] sm:$0xf0] }
 0x38c   : > { %1609 = vmatpush.bf16.msrb.mxu1 %v2617_v9  ;;  %1635 = vmatpush.bf16.msrb.mxu3 %v2625_v10  ;;  %v2824_v9 = vld [vmem:[#allocation11 + $0xc0] sm:$0xf]  ;;  %v3126_v10 = vld [vmem:[#allocation11 + $0xc4] sm:$0xf0] }
 0x38d   : > { %v1391_v8 = vadd.f32 %v1390_v6, %v1389_v63  ;;  %v1352_v47 = vmax.f32 %v4158_v62, %v1351_v43  ;;  %v2841_v63 = vor.u32 %v3130_v59, %v2840_v23  ;;  %v2832_v62 = vld [vmem:[#allocation11 + $0xd0] sm:$0xf]  ;;  %v3148_v6 = vld [vmem:[#allocation11 + $0x174] sm:$0xf0]  ;;  %v2728_v43 = vld [vmem:[#allocation11] sm:$0xf] }
 0x38e   : > { %v2833_v4 = vor.u32 %v3128_v0, %v2832_v62  ;;  %v2913_v15 = vor.u32 %v3148_v6, %v2912_v5  ;;  %v2729_v51 = vor.u32 %v3102_v44, %v2728_v43  ;;  %v3118_v53 = vld [vmem:[#allocation11 + $0x84] sm:$0xf0]  ;;  %v2968_v23 = vld [vmem:[#allocation11 + $0x1e0] sm:$0xf]  ;;  %v3113_v0 = vld [vmem:[#allocation11 + $0x64] sm:$0xf] }
 0x38f   : > { %v1392_v13 = vrot.slane %v1391_v8, 1  ;;  %v1353_v49 = vrot.slane %v1352_v47, 2  ;;  %2061 = vmatpush.bf16.msrb.mxu2 %v2785_v52  ;;  %v2792_v52 = vld [vmem:[#allocation11 + $0x80] sm:$0xf]  ;;  %v3138_v61 = vld [vmem:[#allocation11 + $0x124] sm:$0xf0] }
 0x390   : > { %1610 = vmatpush.bf16.msrb.mxu1 %v2601_v18  ;;  %1636 = vmatpush.bf16.msrb.mxu3 %v2609_v30  ;;  %v2825_v18 = vor.u32 %v3126_v10, %v2824_v9  ;;  %v2745_v30 = vor.u32 %v3106_v27, %v2744_v26  ;;  %v2793_v59 = vor.u32 %v3118_v53, %v2792_v52  ;;  %v3136_v5 = vld [vmem:[#allocation11 + $0x114] sm:$0xf0]  ;;  %v2770_v9 = vld [vmem:[#allocation11 + $0x58] sm:$0xf0]  ;;  %v2952_v10 = vld [vmem:[#allocation11 + $0x1c0] sm:$0xf] }
 0x391   : > { %v1393_v16 = vadd.f32 %v1392_v13, %v1391_v8  ;;  %v1354_v57 = vmax.f32 %v1352_v47, %v1353_v49  ;;  %v2761_v8 = vor.u32 %v3110_v42, %v2760_v3  ;;  %v3108_v13 = vld [vmem:[#allocation11 + $0x34] sm:$0xf0]  ;;  %v2873_v42 = vor.u32 %v3138_v61, %v2872_v60  ;;  %v3127_v44 = vld [vmem:[#allocation11 + $0xd4] sm:$0xf]  ;;  %v3125_v53 = vld [vmem:[#allocation11 + $0xc4] sm:$0xf] }
 0x392   : > { %v2753_v21 = vor.u32 %v3108_v13, %v2752_v12  ;;  %v3160_v3 = vld [vmem:[#allocation11 + $0x1d4] sm:$0xf0]  ;;  %v2856_v13 = vld [vmem:[#allocation11 + $0x100] sm:$0xf]  ;;  %v3121_v61 = vld [vmem:[#allocation11 + $0xa4] sm:$0xf] }
 0x393   : > { %v1394_v20 = vmul.f32 0.0078125, %v1393_v16  ;;  %v1355_v1 = vrot.slane %v1354_v57, 1  ;;  %2062 = vmatpush.bf16.msrb.mxu2 %v2777_v58  ;;  %v2881_v58 = vor.u32 %v3140_v50, %v2880_v48  ;;  %v3103_v50 = vld [vmem:[#allocation11 + $0x14] sm:$0xf] }
 0x394   : > { %1642 = vmatpush.bf16.msra.mxu1 %v2725_v19  ;;  %2074 = vmatpush.bf16.msra.mxu3 %v2849_v56  ;;  %v2904_v19 = vld [vmem:[#allocation11 + $0x160] sm:$0xf]  ;;  %v2786_v56 = vld [vmem:[#allocation11 + $0x78] sm:$0xf0] }
 0x395   : > { %1396 = vrot.lane.b32.xlu0 %v1394_v20, %s3608_s24  ;;  %v1356_v7 = vmax.f32 %v1354_v57, %v1355_v1  ;;  %v3146_v20 = vld [vmem:[#allocation11 + $0x164] sm:$0xf0]  ;;  %v2778_v1 = vld [vmem:[#allocation11 + $0x68] sm:$0xf0] }
 0x396   : > { %v3162_v57 = vld [vmem:[#allocation11 + $0x1e4] sm:$0xf0]  ;;  %v2781_v6 = vor.u32 %v3113_v0, %v2778_v1  ;;  %v3119_v0 = vld [vmem:[#allocation11 + $0x94] sm:$0xf]  ;;  %v2802_v1 = vld [vmem:[#allocation11 + $0x98] sm:$0xf0] }
 0x397   : > { %2063 = vmatpush.bf16.msrb.mxu2 %v2769_v2  ;;  %v2969_v62 = vor.u32 %v3162_v57, %v2968_v23  ;;  %v2960_v2 = vld [vmem:[#allocation11 + $0x1d0] sm:$0xf]  ;;  %v2730_v23 = vld [vmem:[#allocation11 + $0x8] sm:$0xf0] }
 0x398   : > { %1643 = vmatpush.bf16.msra.mxu1 %v2709_v25  ;;  %2075 = vmatpush.bf16.msra.mxu3 %v2841_v63  ;;  %v3124_v25 = vld [vmem:[#allocation11 + $0xb4] sm:$0xf0]  ;;  %v2789_v63 = vor.u32 %v3115_v55, %v2786_v56  ;;  %v3101_v56 = vld [vmem:[#allocation11 + $0x4] sm:$0xf] }
 0x399   : > { %v2817_v29 = vor.u32 %v3124_v25, %v2816_v24  ;;  %v2944_v24 = vld [vmem:[#allocation11 + $0x1b0] sm:$0xf]  ;;  %v3156_v25 = vld [vmem:[#allocation11 + $0x1b4] sm:$0xf0]  ;;  %v2733_v57 = vor.u32 %v3101_v56, %v2730_v23 }
 0x39b   : > { %2064 = vmatpush.bf16.msrb.mxu2 %v2761_v8  ;;  %v3111_v8 = vld [vmem:[#allocation11 + $0x54] sm:$0xf] }
 0x39c   : > { %1644 = vmatpush.bf16.msra.mxu1 %v2693_v17  ;;  %2076 = vmatpush.bf16.msra.mxu3 %v2833_v4  ;;  %v2905_v17 = vor.u32 %v3146_v20, %v2904_v19  ;;  %v2864_v4 = vld [vmem:[#allocation11 + $0x110] sm:$0xf]  ;;  %v3109_v20 = vld [vmem:[#allocation11 + $0x44] sm:$0xf] }
 0x39d   : > { %v2865_v12 = vor.u32 %v3136_v5, %v2864_v4  ;;  %v1433_v4 = vld [vmem:[%s4306_s12] sm:$0xf] }
 0x39f   : > { %2065 = vmatpush.bf16.msrb.mxu2 %v2753_v21  ;;  %v2762_v21 = vld [vmem:[#allocation11 + $0x48] sm:$0xf0] }
 0x3a0   : > { %1645 = vmatpush.bf16.msra.mxu1 %v2677_v31  ;;  %2077 = vmatpush.bf16.msra.mxu3 %v2825_v18  ;;  %v3122_v31 = vld [vmem:[#allocation11 + $0xa4] sm:$0xf0]  ;;  %v2850_v18 = vld [vmem:[#allocation11 + $0xf8] sm:$0xf0] }
 0x3a1   : > { %v2809_v34 = vor.u32 %v3122_v31, %v2808_v35  ;;  %v3107_v35 = vld [vmem:[#allocation11 + $0x34] sm:$0xf]  ;;  %v2754_v31 = vld [vmem:[#allocation11 + $0x38] sm:$0xf0] }
 0x3a2   : > { %v2757_v36 = vor.u32 %v3107_v35, %v2754_v31  ;;  %v2898_v35 = vld [vmem:[#allocation11 + $0x158] sm:$0xf0] }
 0x3a3   : > { %2066 = vmatpush.bf16.msrb.mxu2 %v2745_v30 }
 0x3a4   : > { %1646 = vmatpush.bf16.msra.mxu1 %v2661_v38  ;;  %v2897_v38 = vor.u32 %v3144_v33, %v2896_v32  ;;  %2078 = vmatpush.bf16.msra.mxu3 %v2817_v29  ;;  %v2945_v29 = vor.u32 %v3156_v25, %v2944_v24  ;;  %v2936_v32 = vld [vmem:[#allocation11 + $0x1a0] sm:$0xf]  ;;  %v3154_v33 = vld [vmem:[#allocation11 + $0x1a4] sm:$0xf0] }
 0x3a5   : > { %v2937_v30 = vor.u32 %v3154_v33, %v2936_v32  ;;  %v3143_v33 = vld [vmem:[#allocation11 + $0x154] sm:$0xf] }
 0x3a7   : > { %2067 = vmatpush.bf16.msrb.mxu2 %v2737_v41 }
 0x3a8   : > { %1647 = vmatpush.bf16.msra.mxu1 %v2645_v40  ;;  %v3142_v40 = vld [vmem:[#allocation11 + $0x144] sm:$0xf0]  ;;  %2079 = vmatpush.bf16.msra.mxu3 %v2809_v34 }
 0x3a9   : > { %v2889_v47 = vor.u32 %v3142_v40, %v2888_v39  ;;  %v2928_v39 = vld [vmem:[#allocation11 + $0x190] sm:$0xf]  ;;  %v3152_v40 = vld [vmem:[#allocation11 + $0x194] sm:$0xf0] }
 0x3aa   : > { %v2929_v41 = vor.u32 %v3152_v40, %v2928_v39  ;;  %v2970_v39 = vld [vmem:[#allocation11 + $0x1e8] sm:$0xf0] }
 0x3ab   : > { %2068 = vmatpush.bf16.msrb.mxu2 %v2729_v51  ;;  %v2738_v51 = vld [vmem:[#allocation11 + $0x18] sm:$0xf0] }
 0x3ac   : > { %1648 = vmatpush.bf16.msra.mxu1 %v2629_v28  ;;  %v3120_v28 = vld [vmem:[#allocation11 + $0x94] sm:$0xf0]  ;;  %v2741_v52 = vor.u32 %v3103_v50, %v2738_v51  ;;  %v2962_v50 = vld [vmem:[#allocation11 + $0x1d8] sm:$0xf0]  ;;  %v3171_v51 = vld [vmem:[#allocation13 + $0x30] sm:$0xff] }
 0x3ad   : > { %v2801_v49 = vor.u32 %v3120_v28, %v2800_v22  ;;  %v3105_v22 = vld [vmem:[#allocation11 + $0x24] sm:$0xf]  ;;  %v2746_v28 = vld [vmem:[#allocation11 + $0x28] sm:$0xf0] }
 0x3ae   : > { %v2749_v43 = vor.u32 %v3105_v22, %v2746_v28  ;;  %v2901_v22 = vor.u32 %v3143_v33, %v2898_v35  ;;  %v3178_v33 = vld [vmem:[#allocation13 + $0x68] sm:$0xff]  ;;  %v3176_v35 = vld [vmem:[#allocation13 + $0x58] sm:$0xff] }
 0x3af   : > { %2080 = vmatpush.bf16.msra.mxu3 %v2801_v49  ;;  %v3150_v49 = vld [vmem:[#allocation11 + $0x184] sm:$0xf0] }
 0x3b0   : > { %1649 = vmatpush.bf16.msra.mxu1 %v2613_v46  ;;  %v3164_v46 = vld [vmem:[#allocation11 + $0x1f4] sm:$0xf0] }
 0x3b1   : > { %v2977_v54 = vor.u32 %v3164_v46, %v2976_v45  ;;  %v2834_v45 = vld [vmem:[#allocation11 + $0xd8] sm:$0xf0] }
 0x3b2   : > { %v2837_v46 = vor.u32 %v3127_v44, %v2834_v45  ;;  %v2890_v44 = vld [vmem:[#allocation11 + $0x148] sm:$0xf0]  ;;  %v3172_v45 = vld [vmem:[#allocation13 + $0x38] sm:$0xff] }
 0x3b3   : > { %2081 = vmatpush.bf16.msra.mxu3 %v2793_v59  ;;  %v2818_v59 = vld [vmem:[#allocation11 + $0xb8] sm:$0xf0]  ;;  %2302 = vmatpush.bf16.msra.mxu0 %v3172_v45 }
 0x3b7   : > { %2303 = vmatpush.bf16.msra.mxu0 %v3171_v51 }
 0x407   : > { %v1397_v11 = vpop.permute.xlu0 %1396 }
 0x408   : > { %v1399_v14 = vsel %vm823_vm3, %v1356_v7, %v1397_v11  ;;  %v2961_v7 = vor.u32 %v3160_v3, %v2960_v2  ;;  %v3158_v11 = vld [vmem:[#allocation11 + $0x1c4] sm:$0xf0]  ;;  %v2805_v2 = vor.u32 %v3119_v0, %v2802_v1  ;;  %v3117_v3 = vld [vmem:[#allocation11 + $0x84] sm:$0xf]  ;;  %v2874_v0 = vld [vmem:[#allocation11 + $0x128] sm:$0xf0] }
 0x409   : > { %v1400_v16 = vpack.c.bf16 %v1399_v14, %v1399_v14  ;;  %v3134_v14 = vld [vmem:[#allocation11 + $0x104] sm:$0xf0]  ;;  %v2953_v19 = vor.u32 %v3158_v11, %v2952_v10  ;;  %v2914_v10 = vld [vmem:[#allocation11 + $0x178] sm:$0xf0] }
 0x40a   : > { %v2857_v26 = vor.u32 %v3134_v14, %v2856_v13  ;;  %v1597_v13 = vperm.slane %v1433_v4, 2 }
 0x40b   : > { %1611 = vmatmul.bf16.vlgmr.msrb.gmra.mxu1 %v1400_v16  ;;  %1624 = vmatmul.bf16.vlgmr.msra.gmra.mxu2 %v1400_v16 }
 0x40c   : > { %1637 = vmatmul.bf16.vlgmr.msrb.gmra.mxu3 %v1400_v16  ;;  %2087 = vmatpush.bf16.msrb.mxu1 %v2913_v15  ;;  %v2773_v15 = vor.u32 %v3111_v8, %v2770_v9  ;;  %v3147_v9 = vld [vmem:[#allocation11 + $0x174] sm:$0xf] }
 0x40d   : > { %2100 = vmatpush.bf16.msra.mxu2 %v2977_v54  ;;  %2113 = vmatpush.bf16.msrb.mxu3 %v2789_v63  ;;  %v2826_v54 = vld [vmem:[#allocation11 + $0xc8] sm:$0xf0] }
 0x40e   : > { %v2829_v55 = vor.u32 %v3125_v53, %v2826_v54  ;;  %v2810_v63 = vld [vmem:[#allocation11 + $0xa8] sm:$0xf0]  ;;  %v3139_v54 = vld [vmem:[#allocation11 + $0x134] sm:$0xf] }
 0x410   : > { %2088 = vmatpush.bf16.msrb.mxu1 %v2905_v17  ;;  %v2765_v17 = vor.u32 %v3109_v20, %v2762_v21  ;;  %v2906_v20 = vld [vmem:[#allocation11 + $0x168] sm:$0xf0] }
 0x411   : > { %2101 = vmatpush.bf16.msra.mxu2 %v2969_v62  ;;  %2114 = vmatpush.bf16.msrb.mxu3 %v2781_v6  ;;  %v2813_v62 = vor.u32 %v3121_v61, %v2810_v63  ;;  %v1595_v6 = vperm.slane %v1433_v4, 0 }
 0x414   : > { %2089 = vmatpush.bf16.msrb.mxu1 %v2897_v38  ;;  %v2842_v38 = vld [vmem:[#allocation11 + $0xe8] sm:$0xf0] }
 0x415   : > { %2102 = vmatpush.bf16.msra.mxu2 %v2961_v7  ;;  %2115 = vmatpush.bf16.msrb.mxu3 %v2773_v15  ;;  %v2845_v34 = vor.u32 %v3129_v37, %v2842_v38  ;;  %v2917_v15 = vor.u32 %v3147_v9, %v2914_v10  ;;  %v3153_v9 = vld [vmem:[#allocation11 + $0x1a4] sm:$0xf]  ;;  %v2938_v10 = vld [vmem:[#allocation11 + $0x1a8] sm:$0xf0] }
 0x418   : > { %2090 = vmatpush.bf16.msrb.mxu1 %v2889_v47  ;;  %v2920_v47 = vld [vmem:[#allocation11 + $0x180] sm:$0xf] }
 0x419   : > { %2103 = vmatpush.bf16.msra.mxu2 %v2953_v19  ;;  %2116 = vmatpush.bf16.msrb.mxu3 %v2765_v17  ;;  %v2921_v48 = vor.u32 %v3150_v49, %v2920_v47  ;;  %v3145_v19 = vld [vmem:[#allocation11 + $0x164] sm:$0xf]  ;;  %v2978_v17 = vld [vmem:[#allocation11 + $0x1f8] sm:$0xf0] }
 0x41a   : > { %v2909_v32 = vor.u32 %v3145_v19, %v2906_v20  ;;  %v2930_v19 = vld [vmem:[#allocation11 + $0x198] sm:$0xf0]  ;;  %v3167_v20 = vld [vmem:[#allocation13 + $0x10] sm:$0xff] }
 0x41b   : > { %1650 = vmatmul.bf16.vlgmr.msra.gmra.mxu1 %v1400_v16  ;;  %v3131_v16 = vld [vmem:[#allocation11 + $0xf4] sm:$0xf] }
 0x41c   : > { %2091 = vmatpush.bf16.msrb.mxu1 %v2881_v58  ;;  %v2853_v27 = vor.u32 %v3131_v16, %v2850_v18  ;;  %v3123_v58 = vld [vmem:[#allocation11 + $0xb4] sm:$0xf] }
 0x41d   : > { %2104 = vmatpush.bf16.msra.mxu2 %v2945_v29  ;;  %2117 = vmatpush.bf16.msrb.mxu3 %v2757_v36  ;;  %v2821_v60 = vor.u32 %v3123_v58, %v2818_v59  ;;  %v2954_v58 = vld [vmem:[#allocation11 + $0x1c8] sm:$0xf0] }
 0x41e   : > { %v3170_v59 = vld [vmem:[#allocation13 + $0x28] sm:$0xff] }
 0x41f   : > { %2304 = vmatpush.bf16.msra.mxu0 %v3170_v59 }
 0x420   : > { %2092 = vmatpush.bf16.msrb.mxu1 %v2873_v42  ;;  %v2794_v42 = vld [vmem:[#allocation11 + $0x88] sm:$0xf0] }
 0x421   : > { %2105 = vmatpush.bf16.msra.mxu2 %v2937_v30  ;;  %2118 = vmatpush.bf16.msrb.mxu3 %v2749_v43  ;;  %v2797_v5 = vor.u32 %v3117_v3, %v2794_v42  ;;  %v3141_v43 = vld [vmem:[#allocation11 + $0x144] sm:$0xf]  ;;  %v3155_v3 = vld [vmem:[#allocation11 + $0x1b4] sm:$0xf]  ;;  %v2946_v42 = vld [vmem:[#allocation11 + $0x1b8] sm:$0xf0] }
 0x422   : > { %v2893_v53 = vor.u32 %v3141_v43, %v2890_v44  ;;  %v3173_v43 = vld [vmem:[#allocation13 + $0x40] sm:$0xff] }
 0x424   : > { %2093 = vmatpush.bf16.msrb.mxu1 %v2865_v12  ;;  %v1596_v12 = vperm.slane %v1433_v4, 1 }
 0x425   : > { %2106 = vmatpush.bf16.msra.mxu2 %v2929_v41  ;;  %2119 = vmatpush.bf16.msrb.mxu3 %v2741_v52  ;;  %v1598_v41 = vperm.slane %v1433_v4, 3  ;;  %v3169_v4 = vld [vmem:[#allocation13 + $0x20] sm:$0xff] }
 0x426   : > { %2305 = vmatpush.bf16.msra.mxu0 %v3169_v4 }
 0x428   : > { %2094 = vmatpush.bf16.msrb.mxu1 %v2857_v26 }
 0x429   : > { %2107 = vmatpush.bf16.msra.mxu2 %v2921_v48  ;;  %2120 = vmatpush.bf16.msrb.mxu3 %v2733_v57  ;;  %v3159_v48 = vld [vmem:[#allocation11 + $0x1d4] sm:$0xf]  ;;  %v3157_v57 = vld [vmem:[#allocation11 + $0x1c4] sm:$0xf] }
 0x42a   : > { %v2965_v23 = vor.u32 %v3159_v48, %v2962_v50  ;;  %v2957_v1 = vor.u32 %v3157_v57, %v2954_v58 }
 0x42c   : > { %2126 = vmatpush.bf16.msra.mxu1 %v2853_v27  ;;  %v3163_v27 = vld [vmem:[#allocation11 + $0x1f4] sm:$0xf] }
 0x42d   : > { %v2981_v36 = vor.u32 %v3163_v27, %v2978_v17  ;;  %v3166_v27 = vld [vmem:[#allocation13 + $0x8] sm:$0xff]  ;;  %v3180_v17 = vld [vmem:[#allocation13 + $0x78] sm:$0xff] }
 0x430   : > { %2127 = vmatpush.bf16.msra.mxu1 %v2845_v34  ;;  %v3161_v34 = vld [vmem:[#allocation11 + $0x1e4] sm:$0xf] }
 0x431   : > { %v2973_v47 = vor.u32 %v3161_v34, %v2970_v39 }
 0x434   : > { %2128 = vmatpush.bf16.msra.mxu1 %v2837_v46 }
 0x438   : > { %2129 = vmatpush.bf16.msra.mxu1 %v2829_v55  ;;  %v2882_v55 = vld [vmem:[#allocation11 + $0x138] sm:$0xf0] }
 0x439   : > { %v2885_v61 = vor.u32 %v3139_v54, %v2882_v55 }
 0x43c   : > { %2130 = vmatpush.bf16.msra.mxu1 %v2821_v60 }
 0x440   : > { %2131 = vmatpush.bf16.msra.mxu1 %v2813_v62  ;;  %v3137_v62 = vld [vmem:[#allocation11 + $0x124] sm:$0xf] }
 0x444   : > { %2132 = vmatpush.bf16.msra.mxu1 %v2805_v2 }
 0x448   : > { %2133 = vmatpush.bf16.msra.mxu1 %v2797_v5  ;;  %v2877_v5 = vor.u32 %v3137_v62, %v2874_v0 }
 0x488   : > { %v1612_v7 = vpop.f32.mrf.mxu1 }
 0x489   : > { %v1613_v8 = vadd.f32 %v1612_v7, %v1595_v6  ;;  %v3135_v6 = vld [vmem:[#allocation11 + $0x114] sm:$0xf]  ;;  %v2866_v7 = vld [vmem:[#allocation11 + $0x118] sm:$0xf0] }
 0x48b   : > { %vm1655_vm4 = vcmp.gt.f32.partialorder %v1613_v8, 0.0  ;;  %v1659_v11 = vmul.f32 0.2, %v1613_v8 }
 0x48d   : > { %v1663_v14 = vsel %vm1655_vm4, %v1613_v8, %v1659_v11  ;;  %v2949_v8 = vor.u32 %v3155_v3, %v2946_v42  ;;  %v3168_v11 = vld [vmem:[#allocation13 + $0x18] sm:$0xff] }
 0x48e   : > { %v4244_v16 = vpack.c.bf16 %v1663_v14, %v1663_v14  ;;  %v1625_v18 = vpop.f32.mrf.mxu2  ;;  %v2858_v14 = vld [vmem:[#allocation11 + $0x108] sm:$0xf0]  ;;  %2306 = vmatpush.bf16.msra.mxu0 %v3168_v11 }
 0x48f   : > { %v1626_v21 = vadd.f32 %v1625_v18, %v1596_v12  ;;  %v1638_v24 = vpop.f32.mrf.mxu3  ;;  %v2869_v12 = vor.u32 %v3135_v6, %v2866_v7  ;;  %v3151_v18 = vld [vmem:[#allocation11 + $0x194] sm:$0xf] }
 0x490   : > { %v1639_v25 = vadd.f32 %v1638_v24, %v1597_v13  ;;  %v1614_v26 = vpop.f32.mrf.mxu1  ;;  %2069 = vmatmul.bf16.vlgmr.msrb.gmra.mxu2 %v4244_v16  ;;  %v3133_v13 = vld [vmem:[#allocation11 + $0x104] sm:$0xf]  ;;  %v2933_v24 = vor.u32 %v3151_v18, %v2930_v19 }
 0x491   : > { %vm1656_vm5 = vcmp.gt.f32.partialorder %v1626_v21, 0.0  ;;  %v1660_v29 = vmul.f32 0.2, %v1626_v21  ;;  %2139 = vmatpush.bf16.msrb.mxu2 %v2917_v15  ;;  %v2941_v15 = vor.u32 %v3153_v9, %v2938_v10  ;;  %v2922_v26 = vld [vmem:[#allocation11 + $0x188] sm:$0xf0] }
 0x492   : > { %vm1657_vm6 = vcmp.gt.f32.partialorder %v1639_v25, 0.0  ;;  %v1661_v30 = vmul.f32 0.2, %v1639_v25  ;;  %2307 = vmatpush.bf16.msra.mxu0 %v3167_v20 }
 0x493   : > { %v1664_v31 = vsel %vm1656_vm5, %v1626_v21, %v1660_v29  ;;  %v2861_v21 = vor.u32 %v3133_v13, %v2858_v14  ;;  %v3179_v29 = vld [vmem:[#allocation13 + $0x70] sm:$0xff] }
 0x494   : > { %v4247_v37 = vpack.c.bf16 %v1664_v31, %v1664_v31  ;;  %v1665_v38 = vsel %vm1657_vm6, %v1639_v25, %v1661_v30  ;;  %v3149_v25 = vld [vmem:[#allocation11 + $0x184] sm:$0xf] }
 0x495   : > { %v4249_v40 = vpack.c.bf16 %v1665_v38, %v1665_v38  ;;  %2140 = vmatpush.bf16.msrb.mxu2 %v2909_v32  ;;  %v3165_v32 = vld [vmem:[#allocation13] sm:$0xff]  ;;  %v1735_v38 = vld [vmem:[%s4308_s14] sm:$0x3] }
 0x496   : > { %v1627_v28 = vpop.f32.mrf.mxu2  ;;  %2082 = vmatmul.bf16.vlgmr.msra.gmra.mxu3 %v4247_v37  ;;  %2308 = vmatpush.bf16.msra.mxu0 %v3166_v27  ;;  %v3177_v30 = vld [vmem:[#allocation13 + $0x60] sm:$0xff]  ;;  %v2057_v34 = vperm.slane %v1735_v38, 0 }
 0x497   : > { %v1640_v46 = vpop.f32.mrf.mxu3  ;;  %2095 = vmatmul.bf16.vlgmr.msrb.gmra.mxu1 %v4249_v40  ;;  %2152 = vmatpush.bf16.msra.mxu3 %v2981_v36 }
 0x498   : > { %v1651_v49 = vpop.f32.mrf.mxu1  ;;  %2315 = vmatpush.bf16.msrb.mxu1 %v3180_v17 }
 0x499   : > { %v1652_v52 = vadd.f32 %v1651_v49, %v1598_v41  ;;  %2141 = vmatpush.bf16.msrb.mxu2 %v2901_v22 }
 0x49a   : > { %2309 = vmatpush.bf16.msra.mxu0 %v3165_v32 }
 0x49b   : > { %vm1658_vm7 = vcmp.gt.f32.partialorder %v1652_v52, 0.0  ;;  %v1662_v56 = vmul.f32 0.2, %v1652_v52  ;;  %2153 = vmatpush.bf16.msra.mxu3 %v2973_v47 }
 0x49c   : > { %2316 = vmatpush.bf16.msrb.mxu1 %v3179_v29 }
 0x49d   : > { %v1666_v60 = vsel %vm1658_vm7, %v1652_v52, %v1662_v56  ;;  %2142 = vmatpush.bf16.msrb.mxu2 %v2893_v53  ;;  %v2058_v56 = vperm.slane %v1735_v38, 1 }
 0x49e   : > { %v1670_v63 = vpack.c.bf16 %v1666_v60, %v1666_v60 }
 0x49f   : > { %2154 = vmatpush.bf16.msra.mxu3 %v2965_v23 }
 0x4a0   : > { %v1653_v2 = vpop.f32.mrf.mxu1  ;;  %2108 = vmatmul.bf16.vlgmr.msra.gmra.mxu2 %v1670_v63  ;;  %2317 = vmatpush.bf16.msrb.mxu1 %v3178_v33 }
 0x4a1   : > { %2143 = vmatpush.bf16.msrb.mxu2 %v2885_v61 }
 0x4a3   : > { %2155 = vmatpush.bf16.msra.mxu3 %v2957_v1 }
 0x4a4   : > { %2318 = vmatpush.bf16.msrb.mxu1 %v3177_v30 }
 0x4a5   : > { %2144 = vmatpush.bf16.msrb.mxu2 %v2877_v5  ;;  %v2205_v5 = vld [vmem:[%s4343_s21] sm:$0x1] }
 0x4a6   : > { %2121 = vmatmul.bf16.vlgmr.msrb.gmra.mxu3 %v4244_v16  ;;  %v2925_v16 = vor.u32 %v3149_v25, %v2922_v26 }
 0x4a7   : > { %2134 = vmatmul.bf16.vlgmr.msra.gmra.mxu1 %v4247_v37  ;;  %2156 = vmatpush.bf16.msra.mxu3 %v2949_v8  ;;  %v3175_v37 = vld [vmem:[#allocation13 + $0x50] sm:$0xff] }
 0x4a8   : > { %2319 = vmatpush.bf16.msrb.mxu1 %v3176_v35 }
 0x4a9   : > { %2145 = vmatpush.bf16.msrb.mxu2 %v2869_v12 }
 0x4ab   : > { %2157 = vmatpush.bf16.msra.mxu3 %v2941_v15 }
 0x4ac   : > { %2320 = vmatpush.bf16.msrb.mxu1 %v3175_v37 }
 0x4ad   : > { %2146 = vmatpush.bf16.msrb.mxu2 %v2861_v21 }
 0x4af   : > { %2158 = vmatpush.bf16.msra.mxu3 %v2933_v24 }
 0x4b0   : > { %2147 = vmatmul.bf16.vlgmr.msrb.gmra.mxu2 %v4249_v40  ;;  %v3174_v40 = vld [vmem:[#allocation13 + $0x48] sm:$0xff] }
 0x4b1   : > { %2321 = vmatpush.bf16.msrb.mxu1 %v3174_v40 }
 0x4b3   : > { %2159 = vmatpush.bf16.msra.mxu3 %v2925_v16 }
 0x4b5   : > { %2322 = vmatpush.bf16.msrb.mxu1 %v3173_v43 }
 0x4b6   : > { %2160 = vmatmul.bf16.vlgmr.msra.gmra.mxu3 %v1670_v63 }
 0x513   : > { %v2070_v31 = vpop.f32.mrf.mxu2 }
 0x514   : > { %v2096_v36 = vpop.f32.mrf.mxu1  ;;  %v2071_v22 = vadd.f32 %v2070_v31, %v2057_v34 }
 0x519   : > { %v2083_v39 = vpop.f32.mrf.mxu3 }
 0x51a   : > { %v2084_v44 = vadd.f32 %v2083_v39, %v2071_v22 }
 0x51b   : > { %v2072_v41 = vpop.f32.mrf.mxu2 }
 0x51c   : > { %v2098_v28 = vpop.f32.mrf.mxu1  ;;  %v2097_v46 = vadd.f32 %v2096_v36, %v2084_v44 }
 0x521   : > { %v2085_v45 = vpop.f32.mrf.mxu3 }
 0x523   : > { %v2109_v47 = vpop.f32.mrf.mxu2 }
 0x524   : > { %v2110_v49 = vadd.f32 %v2109_v47, %v2097_v46  ;;  %v2135_v48 = vpop.f32.mrf.mxu1 }
 0x526   : > { %vm2165_vm8 = vcmp.gt.f32.partialorder %v2110_v49, 0.0  ;;  %v2167_v50 = vmul.f32 0.2, %v2110_v49 }
 0x528   : > { %v2169_v51 = vsel %vm2165_vm8, %v2110_v49, %v2167_v50 }
 0x529   : > { %v2171_v52 = vpack.c.bf16 %v2169_v51, %v2169_v51  ;;  %v2122_v53 = vpop.f32.mrf.mxu3 }
 0x52a   : > { %v2123_v57 = vadd.f32 %v2122_v53, %v2058_v56 }
 0x52b   : > { %v2111_v54 = vpop.f32.mrf.mxu2  ;;  %2310 = vmatmul.bf16.vlgmr.msra.gmra.mxu0 %v2171_v52 }
 0x52c   : > { %v2137_v55 = vpop.f32.mrf.mxu1  ;;  %v2136_v59 = vadd.f32 %v2135_v48, %v2123_v57 }
 0x531   : > { %v2124_v23 = vpop.f32.mrf.mxu3 }
 0x533   : > { %v2148_v58 = vpop.f32.mrf.mxu2 }
 0x534   : > { %v2149_v60 = vadd.f32 %v2148_v58, %v2136_v59 }
 0x539   : > { %v2161_v61 = vpop.f32.mrf.mxu3 }
 0x53a   : > { %v2162_v63 = vadd.f32 %v2161_v61, %v2149_v60 }
 0x53b   : > { %v2150_v62 = vpop.f32.mrf.mxu2 }
 0x53c   : > { %vm2166_vm9 = vcmp.gt.f32.partialorder %v2162_v63, 0.0  ;;  %v2168_v0 = vmul.f32 0.2, %v2162_v63 }
 0x53e   : > { %v2170_v1 = vsel %vm2166_vm9, %v2162_v63, %v2168_v0 }
 0x53f   : > { %v2172_v2 = vpack.c.bf16 %v2170_v1, %v2170_v1 }
 0x541   : > { %v2163_v3 = vpop.f32.mrf.mxu3  ;;  %2323 = vmatmul.bf16.vlgmr.msrb.gmra.mxu1 %v2172_v2 }
 0x5a8   : > { %v2311_v42 = vpop.f32.mrf.mxu0 }
 0x5a9   : > { %v2312_v6 = vadd.f32 %v2311_v42, %v2205_v5 }
 0x5b0   : > { %v2313_v4 = vpop.f32.mrf.mxu0 }
 0x5be   : > { %v2324_v7 = vpop.f32.mrf.mxu1 }
 0x5bf   : > { %v2325_v8 = vadd.f32 %v2324_v7, %v2312_v6 }
 0x5c1   : > { %2328 = vst [vmem:[%s646_s30] sm:$0x1] %v2325_v8 }
 0x5c2   : > { %3543 = shalt.err (!%p3540_p8)
}
 0x5c3   : > { %3213 = dma.vmem_to_hbm [thread:$0]  (%p3737_p5), %s2341_s8, 16, %s2343_s27, %s2330_s1  }
 0x5c6   : > { %v2326_v9 = vpop.f32.mrf.mxu1 }
 0x5c7 PF: > { %s4345_s22 = sld [smem:[#allocation22_spill]] }
 0x5c8   : > { %s4346_s18 = sld [smem:[#allocation20_spill]] }
 0x5cd   : > { %p3255_p9 = scmp.ge.s32.totalorder %s4345_s22, 2 }
 0x5ce   : > { %s2354_s20 = sand.u32 1, %s4346_s18  }
 0x5cf   : > { %p3238_p10 = pnand %p3255_p9, %p3741_p6  ;;  %s2355_s21 = scalar_lea.sflag [#allocation4], %s2354_s20 }
 0x5d1   : > { %p3239_p11 = pneg %p3238_p10 }
 0x5d3   : > { %3577 = dma.done.wait (%p3239_p11), %s2355_s21, 16  }
 0x5d4   : > { %3579 = vsyncadd (%p3239_p11), %s2355_s21, 4294967280  ;;  %s4348_s27 = sld [smem:[#allocation23_spill]]  ;;  %s4351_s24 = smov %s3586_s25 }
 0x5d5   : > { %s4349_s30 = sld [smem:[#allocation21_spill]] }
 0x5d6   : > { %s4350_s26 = sld [smem:[#allocation24_spill]] }
 0x5da   : > { %p31_p12 = scmp.ge.s32.totalorder %s4348_s27, 4  }
 0x5db   : > { %s4352_s25 = smov %s4349_s30 }
 0x5dc   :  { %33 = sbr.rel (!%p31_p12) target bundleno = 14 (0xe), region = 152 }
 0x5e1   :  { %2360 = vsyncpa [#allocation3], 1 }
 0x5e2   :  { %2362 = vsyncpa [#allocation3 + $0x1], 1 }
 0x5e3   :  { %2363 = vsyncpa [#allocation6], 1 }
 0x5e4   :  { %2364 = vsyncpa [#allocation9], 1 }
 0x5e5   :  { %2365 = vsyncpa [#allocation12], 1 }
 0x5e6   :  { %2366 = vsyncpa [#allocation4], 1 }
 0x5e7   :  { %2368 = vsyncpa [#allocation4 + $0x1], 1 }

</bundles_post_ra>
